<compile_context>
chip_gen: v6e
topology: v6e:2x2x1
jax: 0.10.0
libtpu: 0.0.40
codegen_flags: <defaults>
</compile_context>

<pallas_src>
import math
import numpy as np

import jax
import jax.numpy as jnp
from jax.experimental import pallas as pl
from jax.experimental.pallas import tpu as pltpu


OPERATOR_DICT = {'begin_0': 'BEGIN', 'target_0': 'TAR', 'argument_0': 'arg',
                 'end_1': 'END', 'add_2': '+', 'subtract_2': '-',
                 'multiply_2': '*', 'divide_2': '/', 'equal_2': '=',
                 'find_2': 'find', 'order_2': 'ord'}
OPERATOR_DICT_REV = {v: k for k, v in OPERATOR_DICT.items()}

LN_EPS = 1e-12   # matches nn.LayerNorm(d_model, eps=1e-12) in the module


# ----------------------------------------------------------------------------
# Pallas kernel: 3x LayerNorm (affine pre-folded) + fused K=3D linear
# ----------------------------------------------------------------------------
def decoder_embed_kernel(x0_ref, x1_ref, x2_ref, w_ref, b_ref, o_ref):
    # x*_ref : (TILE, D) bf16  operator / operand-1 / operand-2 embeddings
    # w_ref  : (3D, D)   bf16  gamma-folded W.T
    # b_ref  : (1, D)    f32   beta-folded bias
    # o_ref  : (TILE, D) out dtype (bf16 by default)
    d = w_ref.shape[-1]

    def norm_bf16(seg_ref):
        # LayerNorm math in f32 (inputs are DMA'd as bf16), two-pass variance.
        x = seg_ref[...].astype(jnp.float32)
        mu = jnp.mean(x, axis=-1, keepdims=True)
        xc = x - mu
        var = jnp.mean(xc * xc, axis=-1, keepdims=True)
        return (xc * jax.lax.rsqrt(var + LN_EPS)).astype(jnp.bfloat16)

    # Implicit concat: three K=D dots accumulating in f32.  The kernel is
    # mem-bound, so the narrower-than-256 K is irrelevant, and we avoid
    # materializing a (TILE, 3D) temporary.
    acc = jnp.dot(norm_bf16(x0_ref), w_ref[0:d, :],
                  preferred_element_type=jnp.float32)
    acc = acc + jnp.dot(norm_bf16(x1_ref), w_ref[d:2 * d, :],
                        preferred_element_type=jnp.float32)
    acc = acc + jnp.dot(norm_bf16(x2_ref), w_ref[2 * d:3 * d, :],
                        preferred_element_type=jnp.float32)
    o_ref[...] = (acc + b_ref[...]).astype(o_ref.dtype)


# ----------------------------------------------------------------------------
# Host-side, once-per-weight-set fold of the LayerNorm affine into the linear
# layer:  (h*g + b) @ W.T + bias  ==  h @ (g[:,None]*W.T) + (b @ W.T + bias)
# ----------------------------------------------------------------------------
def fold_decoder_embed_params(lin_w, lin_b, g_opt, b_opt, g_opnd, b_opnd):
    g_cat = jnp.concatenate([g_opt, g_opnd, g_opnd]).astype(jnp.float32)   # (3D,)
    b_cat = jnp.concatenate([b_opt, b_opnd, b_opnd]).astype(jnp.float32)   # (3D,)
    w_t = lin_w.T.astype(jnp.float32)                                      # (3D, D)
    w_fold = (g_cat[:, None] * w_t).astype(jnp.bfloat16)                   # (3D, D)
    b_fold = (b_cat[None, :] @ w_t + lin_b[None, :]).astype(jnp.float32)   # (1, D)
    return w_fold, b_fold


def _round_up(a, b):
    return -(-a // b) * b


def decoder_embed_pallas(r0, r1, r2, w_fold, b_fold, *,
                         row_tile=512, out_dtype=jnp.bfloat16):
    """Batched DecoderEmbed.compute_input.

    r0, r1, r2 : (N, D) host-side (numpy) f32 residual embeddings — they are
                 padded and cast to bf16 on the host so the kernel's DMA is the
                 only device pass over the activations.
    w_fold     : (3D, D) bf16 gamma-folded W.T   (from fold_decoder_embed_params)
    b_fold     : (1, D)  f32 beta-folded bias
    """
    r0 = np.asarray(r0, dtype=np.float32)
    r1 = np.asarray(r1, dtype=np.float32)
    r2 = np.asarray(r2, dtype=np.float32)
    N, D = r0.shape
    assert D % 128 == 0, "d_model must be lane-aligned (multiple of 128)"
    assert w_fold.shape == (3 * D, D) and b_fold.shape == (1, D)

    # --- row-tile selection --------------------------------------------------
    # bf16 blocks need the row tile to be a multiple of 16; guarantee >= 2
    # balanced grid steps when N is small so ("parallel",) can shard across
    # v7x's two TensorCores.
    if N < 2 * row_tile:
        tile = min(row_tile, _round_up(pl.cdiv(N, 2), 16))
    else:
        tile = row_tile
    tile = max(tile, 16)

    # Conservative VMEM guard (double-buffered bf16 in/out streams + resident
    # weights) so we stay well inside v5e's 16 MiB default scoped VMEM.
    w_bytes = 3 * D * D * 2
    single_buffer_w = w_bytes > (4 << 20)          # large d_model (v7x 64 MiB VMEM)
    stream_bytes_per_row = (3 * D + D) * 2 * 2     # 3 inputs + 1 output, bf16, 2 bufs
    budget = (12 << 20) - w_bytes * (1 if single_buffer_w else 2) - D * 4 * 2
    if stream_bytes_per_row * tile > budget:
        tile = max(16, (budget // stream_bytes_per_row) // 16 * 16)

    n_pad = _round_up(N, tile)
    grid = (n_pad // tile,)

    # --- host-side pad + bf16 cast (no extra device passes) -------------------
    def prep(r):
        buf = np.zeros((n_pad, D), dtype=jnp.bfloat16)
        buf[:N] = r.astype(jnp.bfloat16)
        return jnp.asarray(buf)

    x0, x1, x2 = prep(r0), prep(r1), prep(r2)

    # --- BlockSpecs ------------------------------------------------------------
    x_spec = pl.BlockSpec((tile, D), lambda i: (i, 0))
    if single_buffer_w:
        # weight never changes across the grid -> single-buffer it at large D
        w_spec = pl.BlockSpec((3 * D, D), lambda i: (0, 0),
                              pipeline_mode=pl.Buffered(1))
    else:
        w_spec = pl.BlockSpec((3 * D, D), lambda i: (0, 0))   # constant -> no re-DMA
    b_spec = pl.BlockSpec((1, D), lambda i: (0, 0))
    o_spec = pl.BlockSpec((tile, D), lambda i: (i, 0))

    out = pl.pallas_call(
        decoder_embed_kernel,
        out_shape=jax.ShapeDtypeStruct((n_pad, D), out_dtype),
        grid_spec=pltpu.PrefetchScalarGridSpec(
            num_scalar_prefetch=0,
            grid=grid,
            in_specs=[x_spec, x_spec, x_spec, w_spec, b_spec],
            out_specs=o_spec,
        ),
        compiler_params=pltpu.CompilerParams(
            dimension_semantics=("parallel",)),
    )(x0, x1, x2, w_fold, b_fold)

    return out[:N] if n_pad != N else out


# ----------------------------------------------------------------------------
# Host-side glue reproducing the module's string/dict token lookup semantics
# (pure numpy; this part has no Pallas equivalent).
# TODO(synk): DecoderEmbed.get_embedding's per-token string/dict parsing is
# host-side Python control flow and cannot be expressed as a TPU kernel.
# ----------------------------------------------------------------------------
def positional_encoding_np(index, d_model):
    # Mirrors PositionalEncoding._forward for an integer index.
    k = (np.arange(d_model) // 2 * 2).astype(np.float32)
    div_term = np.exp(k * (-math.log(10000.0) / d_model))
    phase = np.float32(index) * div_term
    even = (np.arange(d_model) % 2) == 0          # sin on even lanes, cos on odd
    return np.where(even, np.sin(phase), np.cos(phase)).astype(np.float32)


def build_res_tokens(tokens, float_operand_emb, float_idx_dict, fixed_idx_dict,
                     op_table, const_table, opnd_emb, c_f, c_a, d_model):
    """Replicates DecoderEmbed.get_embedding token parsing -> (res0, res1, res2)."""
    cols = [[], [], []]
    for n1, tup in enumerate(tokens):
        arity = 1
        for n2, element in enumerate(tup):
            if int(arity) >= n2:
                if element in OPERATOR_DICT_REV:
                    idx = fixed_idx_dict['operator'][OPERATOR_DICT_REV[element]]
                    emb = c_f * op_table[idx] + positional_encoding_np(n1 + 1, d_model)
                    arity = OPERATOR_DICT_REV[element].split('_')[1]
                elif element in float_idx_dict:
                    emb = c_a * opnd_emb[0] + float_operand_emb[float_idx_dict[element]]
                elif 'R' in element:
                    idx = int(element.replace('R', ''))
                    emb = c_a * opnd_emb[1] + positional_encoding_np(idx + 1, d_model)
                elif element in fixed_idx_dict['constant']:
                    idx = fixed_idx_dict['constant'][element]
                    emb = c_a * opnd_emb[2] + const_table[idx]
                else:
                    raise NotImplementedError(f'{element}: not in target dictionary.')
            else:
                emb = np.zeros((d_model,), np.float32)
            cols[n2].append(np.asarray(emb, np.float32))
    return tuple(np.stack(c).astype(np.float32) for c in cols)


# ----------------------------------------------------------------------------
if __name__ == "__main__":
    D = 128                       # d_model (lane-aligned)
    N_CONST = 3
    N_FLOAT = 3
    N_OPS = len(OPERATOR_DICT)

    key = jax.random.PRNGKey(0)
    ks = jax.random.split(key, 10)

    # Synthetic frozen tables / parameters (deterministic; no checkpoint load).
    op_table = np.asarray(jax.random.normal(ks[0], (N_OPS, D), jnp.float32))
    const_table = np.asarray(jax.random.normal(ks[1], (N_CONST, D), jnp.float32))
    opnd_emb = np.asarray(jax.random.normal(ks[2], (3, D), jnp.float32))        # nn.Embedding(3, D)
    float_operand_emb = np.asarray(jax.random.normal(ks[3], (N_FLOAT, D), jnp.float32))

    lin_w = jax.random.normal(ks[4], (D, 3 * D), jnp.float32) * 0.02            # torch (out, in)
    lin_b = jax.random.normal(ks[5], (D,), jnp.float32) * 0.02
    g_opt = 1.0 + 0.1 * jax.random.normal(ks[6], (D,), jnp.float32)
    b_opt = 0.05 * jax.random.normal(ks[7], (D,), jnp.float32)
    g_opnd = 1.0 + 0.1 * jax.random.normal(ks[8], (D,), jnp.float32)
    b_opnd = 0.05 * jax.random.normal(ks[9], (D,), jnp.float32)
    c_f = 1.0    # operator_param (degrade_factor)
    c_a = 1.0    # operand_param

    fixed_idx_dict = {
        'operator': {k: i for i, k in enumerate(OPERATOR_DICT.keys())},
        'constant': {'1': 0, 'pi': 1, '100': 2},
    }
    float_idx_dict = {'N0': 0, 'N1': 1, 'N2': 2}

    base_tokens = [
        ('+',    'N0',  'N1'),
        ('-',    'R0',  '1'),
        ('*',    'N1',  'pi'),
        ('/',    'N2',  'R1'),
        ('=',    'R2',  'N0'),
        ('TAR',  'R0',  'N0'),   # arity 0 -> both operands become zero vectors
        ('find', '100', 'N2'),
        ('END',  'N0',  'N1'),   # arity 1 -> second operand becomes zero vector
    ]
    tokens = base_tokens * 32    # N = 256 tokens -> 2 balanced grid steps of 128 rows

    r0, r1, r2 = build_res_tokens(tokens, float_operand_emb, float_idx_dict,
                                  fixed_idx_dict, op_table, const_table,
                                  opnd_emb, c_f, c_a, D)

    # Hoisted once-per-weight-set fold of the LN affine into the linear layer.
    w_fold, b_fold = fold_decoder_embed_params(lin_w, lin_b,
                                               g_opt, b_opt, g_opnd, b_opnd)
    w_fold, b_fold = jax.block_until_ready((w_fold, b_fold))

    out = decoder_embed_pallas(r0, r1, r2, w_fold, b_fold, row_tile=512)
    out = jax.block_until_ready(out)

    # Pure numpy f32 reference for correctness (kernel carries activations and
    # weights in bf16, so tolerances are loosened accordingly).
    def ln_ref(x, g, b):
        mu = x.mean(-1, keepdims=True)
        var = ((x - mu) ** 2).mean(-1, keepdims=True)
        return (x - mu) / np.sqrt(var + LN_EPS) * g + b

    g_opt_n, b_opt_n = np.asarray(g_opt), np.asarray(b_opt)
    g_opnd_n, b_opnd_n = np.asarray(g_opnd), np.asarray(b_opnd)
    cat = np.concatenate([ln_ref(r0, g_opt_n, b_opt_n),
                          ln_ref(r1, g_opnd_n, b_opnd_n),
                          ln_ref(r2, g_opnd_n, b_opnd_n)], axis=-1)
    ref = cat @ np.asarray(lin_w).T + np.asarray(lin_b)

    np.testing.assert_allclose(np.asarray(out).astype(np.float32), ref,
                               atol=3e-2, rtol=3e-2)
    assert out.shape == (len(tokens), D)
    print("KERNEL_OK")
</pallas_src>

<mosaic_0001>
module attributes {stable_mosaic.version = 11 : i64} {
  func.func @decoder_embed_kernel(%arg0: i32, %arg1: memref<128x128xbf16, #tpu.memory_space<vmem>>, %arg2: memref<128x128xbf16, #tpu.memory_space<vmem>>, %arg3: memref<128x128xbf16, #tpu.memory_space<vmem>>, %arg4: memref<384x128xbf16, #tpu.memory_space<vmem>>, %arg5: memref<1x128xf32, #tpu.memory_space<vmem>>, %arg6: memref<128x128xbf16, #tpu.memory_space<vmem>>) attributes {dimension_semantics = [#tpu.dimension_semantics<parallel>], iteration_bounds = array<i64: 2>, scalar_prefetch = 0 : i64, scratch_operands = 0 : i64, tpu.core_type = #tpu.core_type<tc>, window_params = [{transform_indices = @transform_0, window_bounds = array<i64: 128, 128>}, {transform_indices = @transform_1, window_bounds = array<i64: 128, 128>}, {transform_indices = @transform_2, window_bounds = array<i64: 128, 128>}, {pipeline_mode = #tpu.pipeline_mode<synchronous>, transform_indices = @transform_3, window_bounds = array<i64: 384, 128>}, {pipeline_mode = #tpu.pipeline_mode<synchronous>, transform_indices = @transform_4, window_bounds = array<i64: 1, 128>}, {transform_indices = @transform_5, window_bounds = array<i64: 128, 128>}]} {
    %c0 = arith.constant 0 : index
    %c0_0 = arith.constant 0 : index
    %0 = vector.load %arg1[%c0, %c0_0] : memref<128x128xbf16, #tpu.memory_space<vmem>>, vector<128x128xbf16>
    %1 = arith.extf %0 : vector<128x128xbf16> to vector<128x128xf32>
    %cst = arith.constant dense<0.000000e+00> : vector<128xf32>
    %2 = vector.multi_reduction <add>, %1, %cst [1] : vector<128x128xf32> to vector<128xf32>
    %3 = vector.shape_cast %2 : vector<128xf32> to vector<128x1xf32>
    %cst_1 = arith.constant 1.280000e+02 : f32
    %4 = vector.broadcast %cst_1 : f32 to vector<128x1xf32>
    %5 = arith.divf %3, %4 : vector<128x1xf32>
    %6 = vector.broadcast %5 : vector<128x1xf32> to vector<128x128xf32>
    %7 = arith.subf %1, %6 : vector<128x128xf32>
    %8 = arith.mulf %7, %7 : vector<128x128xf32>
    %cst_2 = arith.constant dense<0.000000e+00> : vector<128xf32>
    %9 = vector.multi_reduction <add>, %8, %cst_2 [1] : vector<128x128xf32> to vector<128xf32>
    %10 = vector.shape_cast %9 : vector<128xf32> to vector<128x1xf32>
    %cst_3 = arith.constant 1.280000e+02 : f32
    %11 = vector.broadcast %cst_3 : f32 to vector<128x1xf32>
    %12 = arith.divf %10, %11 : vector<128x1xf32>
    %cst_4 = arith.constant 9.99999996E-13 : f32
    %13 = vector.broadcast %cst_4 : f32 to vector<128x1xf32>
    %14 = arith.addf %12, %13 : vector<128x1xf32>
    %15 = math.rsqrt %14 : vector<128x1xf32>
    %16 = vector.broadcast %15 : vector<128x1xf32> to vector<128x128xf32>
    %17 = arith.mulf %7, %16 : vector<128x128xf32>
    %18 = arith.truncf %17 : vector<128x128xf32> to vector<128x128xbf16>
    %c0_5 = arith.constant 0 : index
    %c0_6 = arith.constant 0 : index
    %19 = vector.load %arg4[%c0_5, %c0_6] : memref<384x128xbf16, #tpu.memory_space<vmem>>, vector<128x128xbf16>
    %cst_7 = arith.constant dense<0.000000e+00> : vector<128x128xf32>
    %20 = tpu.matmul %18, %19, %cst_7 {dimension_numbers = #tpu.dot_dimension_numbers<[1], [0], [0], [1], [0, 0, 1, 1], [], []>} : vector<128x128xbf16>, vector<128x128xbf16>, vector<128x128xf32> -> vector<128x128xf32>
    %c0_8 = arith.constant 0 : index
    %c0_9 = arith.constant 0 : index
    %21 = vector.load %arg2[%c0_8, %c0_9] : memref<128x128xbf16, #tpu.memory_space<vmem>>, vector<128x128xbf16>
    %22 = arith.extf %21 : vector<128x128xbf16> to vector<128x128xf32>
    %cst_10 = arith.constant dense<0.000000e+00> : vector<128xf32>
    %23 = vector.multi_reduction <add>, %22, %cst_10 [1] : vector<128x128xf32> to vector<128xf32>
    %24 = vector.shape_cast %23 : vector<128xf32> to vector<128x1xf32>
    %cst_11 = arith.constant 1.280000e+02 : f32
    %25 = vector.broadcast %cst_11 : f32 to vector<128x1xf32>
    %26 = arith.divf %24, %25 : vector<128x1xf32>
    %27 = vector.broadcast %26 : vector<128x1xf32> to vector<128x128xf32>
    %28 = arith.subf %22, %27 : vector<128x128xf32>
    %29 = arith.mulf %28, %28 : vector<128x128xf32>
    %cst_12 = arith.constant dense<0.000000e+00> : vector<128xf32>
    %30 = vector.multi_reduction <add>, %29, %cst_12 [1] : vector<128x128xf32> to vector<128xf32>
    %31 = vector.shape_cast %30 : vector<128xf32> to vector<128x1xf32>
    %cst_13 = arith.constant 1.280000e+02 : f32
    %32 = vector.broadcast %cst_13 : f32 to vector<128x1xf32>
    %33 = arith.divf %31, %32 : vector<128x1xf32>
    %cst_14 = arith.constant 9.99999996E-13 : f32
    %34 = vector.broadcast %cst_14 : f32 to vector<128x1xf32>
    %35 = arith.addf %33, %34 : vector<128x1xf32>
    %36 = math.rsqrt %35 : vector<128x1xf32>
    %37 = vector.broadcast %36 : vector<128x1xf32> to vector<128x128xf32>
    %38 = arith.mulf %28, %37 : vector<128x128xf32>
    %39 = arith.truncf %38 : vector<128x128xf32> to vector<128x128xbf16>
    %c128 = arith.constant 128 : index
    %c0_15 = arith.constant 0 : index
    %40 = vector.load %arg4[%c128, %c0_15] : memref<384x128xbf16, #tpu.memory_space<vmem>>, vector<128x128xbf16>
    %cst_16 = arith.constant dense<0.000000e+00> : vector<128x128xf32>
    %41 = tpu.matmul %39, %40, %cst_16 {dimension_numbers = #tpu.dot_dimension_numbers<[1], [0], [0], [1], [0, 0, 1, 1], [], []>} : vector<128x128xbf16>, vector<128x128xbf16>, vector<128x128xf32> -> vector<128x128xf32>
    %42 = arith.addf %20, %41 : vector<128x128xf32>
    %c0_17 = arith.constant 0 : index
    %c0_18 = arith.constant 0 : index
    %43 = vector.load %arg3[%c0_17, %c0_18] : memref<128x128xbf16, #tpu.memory_space<vmem>>, vector<128x128xbf16>
    %44 = arith.extf %43 : vector<128x128xbf16> to vector<128x128xf32>
    %cst_19 = arith.constant dense<0.000000e+00> : vector<128xf32>
    %45 = vector.multi_reduction <add>, %44, %cst_19 [1] : vector<128x128xf32> to vector<128xf32>
    %46 = vector.shape_cast %45 : vector<128xf32> to vector<128x1xf32>
    %cst_20 = arith.constant 1.280000e+02 : f32
    %47 = vector.broadcast %cst_20 : f32 to vector<128x1xf32>
    %48 = arith.divf %46, %47 : vector<128x1xf32>
    %49 = vector.broadcast %48 : vector<128x1xf32> to vector<128x128xf32>
    %50 = arith.subf %44, %49 : vector<128x128xf32>
    %51 = arith.mulf %50, %50 : vector<128x128xf32>
    %cst_21 = arith.constant dense<0.000000e+00> : vector<128xf32>
    %52 = vector.multi_reduction <add>, %51, %cst_21 [1] : vector<128x128xf32> to vector<128xf32>
    %53 = vector.shape_cast %52 : vector<128xf32> to vector<128x1xf32>
    %cst_22 = arith.constant 1.280000e+02 : f32
    %54 = vector.broadcast %cst_22 : f32 to vector<128x1xf32>
    %55 = arith.divf %53, %54 : vector<128x1xf32>
    %cst_23 = arith.constant 9.99999996E-13 : f32
    %56 = vector.broadcast %cst_23 : f32 to vector<128x1xf32>
    %57 = arith.addf %55, %56 : vector<128x1xf32>
    %58 = math.rsqrt %57 : vector<128x1xf32>
    %59 = vector.broadcast %58 : vector<128x1xf32> to vector<128x128xf32>
    %60 = arith.mulf %50, %59 : vector<128x128xf32>
    %61 = arith.truncf %60 : vector<128x128xf32> to vector<128x128xbf16>
    %c256 = arith.constant 256 : index
    %c0_24 = arith.constant 0 : index
    %62 = vector.load %arg4[%c256, %c0_24] : memref<384x128xbf16, #tpu.memory_space<vmem>>, vector<128x128xbf16>
    %cst_25 = arith.constant dense<0.000000e+00> : vector<128x128xf32>
    %63 = tpu.matmul %61, %62, %cst_25 {dimension_numbers = #tpu.dot_dimension_numbers<[1], [0], [0], [1], [0, 0, 1, 1], [], []>} : vector<128x128xbf16>, vector<128x128xbf16>, vector<128x128xf32> -> vector<128x128xf32>
    %64 = arith.addf %42, %63 : vector<128x128xf32>
    %c0_26 = arith.constant 0 : index
    %c0_27 = arith.constant 0 : index
    %65 = vector.load %arg5[%c0_26, %c0_27] : memref<1x128xf32, #tpu.memory_space<vmem>>, vector<1x128xf32>
    %66 = vector.broadcast %65 : vector<1x128xf32> to vector<128x128xf32>
    %67 = arith.addf %64, %66 : vector<128x128xf32>
    %68 = arith.truncf %67 : vector<128x128xf32> to vector<128x128xbf16>
    %c0_28 = arith.constant 0 : index
    %c0_29 = arith.constant 0 : index
    %69 = vector.load %arg6[%c0_28, %c0_29] : memref<128x128xbf16, #tpu.memory_space<vmem>>, vector<128x128xbf16>
    tpu.vector_store %arg6[%c0_28, %c0_29], %68 {strides = array<i32>} : memref<128x128xbf16, #tpu.memory_space<vmem>>, vector<128x128xbf16>,
    return
  }
  func.func @transform_0(%arg0: i32) -> (i32, i32) {
    %c0_i32 = arith.constant 0 : i32
    %c0_i32_0 = arith.constant 0 : i32
    return %arg0, %c0_i32 : i32, i32
  }
  func.func @transform_1(%arg0: i32) -> (i32, i32) {
    %c0_i32 = arith.constant 0 : i32
    %c0_i32_0 = arith.constant 0 : i32
    return %arg0, %c0_i32 : i32, i32
  }
  func.func @transform_2(%arg0: i32) -> (i32, i32) {
    %c0_i32 = arith.constant 0 : i32
    %c0_i32_0 = arith.constant 0 : i32
    return %arg0, %c0_i32 : i32, i32
  }
  func.func @transform_3(%arg0: i32) -> (i32, i32) {
    %c0_i32 = arith.constant 0 : i32
    %c0_i32_0 = arith.constant 0 : i32
    %c0_i32_1 = arith.constant 0 : i32
    return %c0_i32, %c0_i32_0 : i32, i32
  }
  func.func @transform_4(%arg0: i32) -> (i32, i32) {
    %c0_i32 = arith.constant 0 : i32
    %c0_i32_0 = arith.constant 0 : i32
    %c0_i32_1 = arith.constant 0 : i32
    return %c0_i32, %c0_i32_0 : i32, i32
  }
  func.func @transform_5(%arg0: i32) -> (i32, i32) {
    %c0_i32 = arith.constant 0 : i32
    %c0_i32_0 = arith.constant 0 : i32
    return %arg0, %c0_i32 : i32, i32
  }
}

</mosaic_0001>

<bundles_post_ra>
// kernel: tpu_custom_call.1
= control target key start
LH: loop header
LB: loop body
LE: loop exit
PB: predicated region body
PF: predicated region fallthrough
CT: control target
= control target key end

     0   :  { %s3460_s0 = inlined_call_operand.hbm [shape: bf16[256,128], index: 0, kind: input, shape index: {}]   ;;  %s3461_s1 = inlined_call_operand.hbm [shape: bf16[256,128], index: 1, kind: input, shape index: {}]   ;;  %s3462_s2 = inlined_call_operand.hbm [shape: bf16[256,128], index: 2, kind: input, shape index: {}]   ;;  %s3463_s3 = inlined_call_operand.hbm [shape: bf16[384,128], index: 3, kind: input, shape index: {}]   ;;  %s3464_s4 = inlined_call_operand.vmem [shape: f32[1,128], index: 4, kind: input, shape index: {}]   ;;  %s3465_s5 = inlined_call_operand.hbm [shape: bf16[256,128], index: 5, kind: output, shape index: {}]  }
   0x1   :  { %3504 = sst [smem:[#allocation23_spill]] %s3461_s1 }
   0x2   :  { %10 = vsyncpa [#allocation3], 0 }
   0x3   :  { %12 = vsyncpa [#allocation3 + $0x1], 0 }
   0x4   :  { %13 = vsyncpa [#allocation6], 0 }
   0x5   :  { %15 = vsyncpa [#allocation6 + $0x1], 0 }
   0x6   :  { %16 = vsyncpa [#allocation9], 0 }
   0x7   :  { %17 = vsyncpa [#allocation4], 0 }
   0x8   :  { %19 = vsyncpa [#allocation4 + $0x1], 0  ;;  %s2554_s18 = smov 0   ;;  %s2556_s19 = smov 0  }
   0x9   :  { %s2558_s20 = smov 0   ;;  %s2560_s21 = smov 0  }
   0xa LB: > { %3505 = sst [smem:[#allocation15_spill]] %s2509_s20  ;;  %s2575_s22 = sadd.s32 1, %s2513_s21   ;;  %s2513_s21 = sphi %s2560_s21, %s3557_s21   ;;  %s2509_s20 = sphi %s2558_s20, %s3559_s20   ;;  %s2505_s19 = sphi %s2556_s19, %s3561_s19   ;;  %s2501_s18 = sphi %s2554_s18, %s3560_s18  }
   0xb   : > { %3506 = sst [smem:[#allocation16_spill]] %s2575_s22  ;;  %s32_s23 = sadd.s32 1, %s2509_s20 }
   0xc   : > { %s29_s24 = ssub.s32 %s2513_s21, %s2575_s22  ;;  %p3466_p0 = scmp.ne.s32.totalorder %s2509_s20, %s2505_s19 }
   0xd   : > { %p30_p1 = scmp.eq.s32.totalorder %s29_s24, 0  ;;  %p40_p2 = scmp.eq.s32.totalorder %s2513_s21, 0 }
   0xe   : > { %p2171_p5 = scmp.lt.s32.totalorder %s2513_s21, 2  ;;  %s205_s26 = sand.u32 1, %s2509_s20  }
   0xf   : > { %s2584_s25 = scalar_select %p30_p1, %s2509_s20, %s32_s23  }
  0x10   : > { %p41_p3 = por %p40_p2, %p3466_p0  ;;  %s2594_s27 = sshll.u32 %s205_s26, 6 }
  0x11   : > { %3507 = sst [smem:[#allocation17_spill]] %s2584_s25  ;;  %s2597_s28 = sshll.u32 %s2513_s21, 10 }
  0x12   : > { %p2599_p6 = pnand %p2171_p5, %p41_p3  ;;  %s226_s30 = sand.u32 1, %s2513_s21  }
  0x13   : > { %s3509_s1 = sld [smem:[#allocation23_spill]]  ;;  %s230_s9 = scalar_lea.vmem [#allocation5], %s2594_s27 }
  0x14   : > { %s237_s10 = sshll.u32 %s230_s9, 4  ;;  %s2613_s11 = scalar_lea.sflag [#allocation6], %s226_s30  ;;  %s2611_s10 = int_to_ptr.vmem [resolvable:$true] %s237_s10 }
  0x15   : > { %p2619_p8 = pneg %p2599_p6 }
  0x19   : > { %s2608_s8 = scalar_lea.hbm %s3509_s1, %s2597_s28  ;;  %s2336_s16 = scalar_lea.hbm %s3509_s1, 2048 }
  0x1a   : > { %s2331_s12 = scalar_lea.hbm %s2608_s8, 1024  ;;  %p2337_p11 = scmp.lt.s32.totalorder %s2608_s8, %s3509_s1 }
  0x1b   : > { %p2332_p7 = scmp.ne.s32.totalorder %s2608_s8, %s2331_s12  ;;  %p2338_p12 = scmp.lt.s32.totalorder %s2336_s16, %s2331_s12 }
  0x1d   : > { %p2334_p9 = pnand %p2619_p8, %p2332_p7  ;;  %p2339_p13 = por %p2338_p12, %p2337_p11 }
  0x1f   : > { %p2335_p10 = pneg %p2334_p9 }
  0x21   : > { %p2340_p1 = pnand %p2339_p13, %p2335_p10 }
  0x23   : > { %2343 = shalt.err (!%p2340_p1)
}
  0x24   : > { %s2344_s24 = scalar_lea.vmem %s2611_s10, 1024  ;;  %s2515_s30 = smov [#allocation5]  }
  0x25   : > { %p2345_p2 = scmp.ne.s32.totalorder %s2611_s10, %s2344_s24  ;;  %s2349_s6 = sshll.u32 %s2515_s30, 4  ;;  %s2350_s6 = int_to_ptr.vmem [resolvable:$false] %s2349_s6 }
  0x26   : > { %s2351_s7 = scalar_lea.vmem %s2350_s6, 2048  ;;  %p2352_p7 = scmp.lt.s32.totalorder %s2611_s10, %s2350_s6 }
  0x27   : > { %p2347_p3 = pnand %p2345_p2, %p2619_p8  ;;  %p2353_p9 = scmp.lt.s32.totalorder %s2351_s7, %s2344_s24 }
  0x29   : > { %p2348_p5 = pneg %p2347_p3  ;;  %p2354_p4 = por %p2353_p9, %p2352_p7 }
  0x2b   : > { %p2355_p0 = pnand %p2354_p4, %p2348_p5 }
  0x2d   : > { %2358 = shalt.err (!%p2355_p0)
}
  0x2e   : > { %s3467_s9 = smov 64   ;;  %s3469_s12 = smov 4  }
  0x2f   : > { %2162 = dma.hbm_to_vmem [thread:$0]  (!%p2599_p6), %s2608_s8, 1024, %s2611_s10, %s2613_s11, %s3467_s9, %s3467_s9, %s3469_s12  }
  0x30   : > { %s2646_s14 = sadd.s32 4294967295, %s2513_s21   ;;  %s1731_s15 = sadd.s32 4294967294, %s2513_s21  }
  0x31   : > { %p45_p0 = scmp.ne.s32.totalorder %s2505_s19, %s2501_s18  ;;  %p3473_p4 = scmp.eq.s32.totalorder %s2646_s14, 0 }
  0x32   : > { %p163_p10 = scmp.eq.s32.totalorder %s2646_s14, 1  ;;  %p169_p11 = scmp.eq.s32.totalorder %s1731_s15, 1 }
  0x33   : > { %p2655_p12 = por %p3473_p4, %p45_p0  ;;  %p1732_p13 = scmp.ge.s32.totalorder %s2513_s21, 1 }
  0x34   : > { %p3512_p1 = scmp.ne.s32.totalorder %s2509_s20, %s2505_s19  ;;  %p2667_p3 = por %p169_p11, %p45_p0 }
  0x35   : > { %s3511_s16 = scalar_select %p2655_p12, 1, 0 }
  0x36   : > { %p2663_p2 = por %p163_p10, %p3512_p1  ;;  %p176_p5 = scmp.lt.s32.totalorder %s2513_s21, 3 }
  0x37   : > { %s3514_s10 = scalar_select %p2667_p3, 1, 0 }
  0x38   : > { %s3513_s8 = scalar_select %p2663_p2, 1, 0 }
  0x39   : > { %p2672_p7 = pnand %p1732_p13, %p176_p5  ;;  %s2518_s23 = smov [#allocation8]  }
  0x3a   : > { %s188_s24 = sshll.u32 %s2518_s23, 4  ;;  %s2684_s7 = scalar_lea.hbm %s3460_s0, %s2597_s28  ;;  %s2676_s24 = int_to_ptr.vmem [resolvable:$true] %s188_s24 }
  0x3b   : > { %s3515_s17 = scalar_select %p2672_p7, 1, 0 }
  0x3c   : > { %p2152_p9 = pneg %p2672_p7  ;;  %s209_s15 = scalar_lea.vmem [#allocation2], %s2594_s27 }
  0x3d   : > { %s216_s9 = sshll.u32 %s209_s15, 4  ;;  %s206_s23 = scalar_lea.sflag [#allocation3], %s205_s26  ;;  %s2693_s9 = int_to_ptr.vmem [resolvable:$true] %s216_s9 }
  0x3e   : > { %p2689_p0 = pnand %p2152_p9, %p3473_p4  ;;  %s2359_s1 = scalar_lea.hbm %s2684_s7, 1024 }
  0x3f   : > { %p2360_p10 = scmp.ne.s32.totalorder %s2684_s7, %s2359_s1  ;;  %s2364_s25 = scalar_lea.hbm %s3460_s0, 2048 }
  0x40   : > { %s3516_s12 = scalar_select %p2689_p0, 1, 0 }
  0x41   : > { %p2362_p11 = pnand %p2360_p10, %p2619_p8  ;;  %p2365_p1 = scmp.lt.s32.totalorder %s2684_s7, %s3460_s0 }
  0x42   : > { %p2366_p5 = scmp.lt.s32.totalorder %s2364_s25, %s2359_s1 }
  0x43   : > { %p2363_p13 = pneg %p2362_p11 }
  0x44   : > { %p2367_p9 = por %p2366_p5, %p2365_p1 }
  0x46   : > { %p2368_p4 = pnand %p2367_p9, %p2363_p13 }
  0x48   : > { %2371 = shalt.err (!%p2368_p4)
}
  0x49   : > { %s2372_s26 = scalar_lea.vmem %s2693_s9, 1024  ;;  %s2519_s20 = smov [#allocation2]  }
  0x4a   : > { %p2373_p3 = scmp.ne.s32.totalorder %s2693_s9, %s2372_s26  ;;  %s2377_s30 = sshll.u32 %s2519_s20, 4  ;;  %s2378_s30 = int_to_ptr.vmem [resolvable:$false] %s2377_s30 }
  0x4b   : > { %s2379_s6 = scalar_lea.vmem %s2378_s30, 2048  ;;  %p2380_p2 = scmp.lt.s32.totalorder %s2693_s9, %s2378_s30 }
  0x4c   : > { %p2375_p10 = pnand %p2373_p3, %p2619_p8  ;;  %p2381_p12 = scmp.lt.s32.totalorder %s2379_s6, %s2372_s26 }
  0x4e   : > { %p2376_p11 = pneg %p2375_p10  ;;  %p2382_p7 = por %p2381_p12, %p2380_p2 }
  0x50   : > { %p2383_p0 = pnand %p2382_p7, %p2376_p11 }
  0x52   : > { %2386 = shalt.err (!%p2383_p0)
}
  0x53   : > { %s3517_s1 = smov 4   ;;  %s3518_s22 = smov 64  }
  0x54   : > { %2159 = dma.hbm_to_vmem [thread:$0]  (!%p2599_p6), %s2684_s7, 1024, %s2693_s9, %s206_s23, %s3518_s22, %s3518_s22, %s3517_s1  }
  0x55   : > { %s2724_s15 = scalar_lea.hbm %s3462_s2, %s2597_s28  ;;  %p3519_p4 = scmp.ne.s32.totalorder %s3516_s12, 0 }
  0x56   : > { %s2398_s26 = scalar_lea.vmem %s2676_s24, 3072  ;;  %p2406_p0 = scmp.lt.s32.totalorder %s2676_s24, %s2676_s24 }
  0x57   : > { %p2389_p12 = pneg %p3519_p4  ;;  %p2399_p2 = scmp.ne.s32.totalorder %s2676_s24, %s2398_s26 }
  0x58   : > { %p2407_p13 = scmp.lt.s32.totalorder %s2398_s26, %s2398_s26 }
  0x59   : > { %p2401_p3 = pnand %p2399_p2, %p2389_p12 }
  0x5a   : > { %p2408_p1 = por %p2407_p13, %p2406_p0 }
  0x5b   : > { %p2402_p7 = pneg %p2401_p3 }
  0x5d   : > { %p2409_p5 = pnand %p2408_p1, %p2402_p7 }
  0x5f   : > { %2412 = shalt.err (!%p2409_p5)
}
  0x60   : > { %2155 = dma.hbm_to_vmem [thread:$0]  (!%p3519_p4), %s3463_s3, 3072, %s2676_s24, [#allocation9], %s3518_s22, %s3518_s22, %s3517_s1  }
  0x61   : > { %s251_s7 = scalar_lea.vmem [#allocation7], %s2594_s27  ;;  %s2413_s30 = scalar_lea.hbm %s2724_s15, 1024 }
  0x62   : > { %s258_s23 = sshll.u32 %s251_s7, 4  ;;  %p2414_p9 = scmp.ne.s32.totalorder %s2724_s15, %s2413_s30  ;;  %s259_s23 = int_to_ptr.vmem [resolvable:$true] %s258_s23 }
  0x63   : > { %s2418_s20 = scalar_lea.hbm %s3462_s2, 2048  ;;  %p2419_p12 = scmp.lt.s32.totalorder %s2724_s15, %s3462_s2 }
  0x64   : > { %p2416_p10 = pnand %p2414_p9, %p2619_p8  ;;  %p2420_p2 = scmp.lt.s32.totalorder %s2418_s20, %s2413_s30 }
  0x66   : > { %p2417_p11 = pneg %p2416_p10  ;;  %p2421_p3 = por %p2420_p2, %p2419_p12 }
  0x68   : > { %p2422_p7 = pnand %p2421_p3, %p2417_p11 }
  0x6a   : > { %2425 = shalt.err (!%p2422_p7)
}
  0x6b   : > { %s2426_s27 = scalar_lea.vmem %s259_s23, 1024  ;;  %s2520_s24 = smov [#allocation7]  }
  0x6c   : > { %p2427_p4 = scmp.ne.s32.totalorder %s259_s23, %s2426_s27  ;;  %s2431_s28 = sshll.u32 %s2520_s24, 4  ;;  %s2432_s28 = int_to_ptr.vmem [resolvable:$false] %s2431_s28 }
  0x6d   : > { %s2433_s9 = scalar_lea.vmem %s2432_s28, 2048  ;;  %p2434_p1 = scmp.lt.s32.totalorder %s259_s23, %s2432_s28 }
  0x6e   : > { %p2429_p0 = pnand %p2427_p4, %p2619_p8  ;;  %p2435_p5 = scmp.lt.s32.totalorder %s2433_s9, %s2426_s27 }
  0x70   : > { %p2430_p13 = pneg %p2429_p0  ;;  %p2436_p9 = por %p2435_p5, %p2434_p1 }
  0x72   : > { %p2437_p10 = pnand %p2436_p9, %p2430_p13 }
  0x74   : > { %2440 = shalt.err (!%p2437_p10)
}
  0x75   : > { %2165 = dma.hbm_to_vmem [thread:$0]  (!%p2599_p6), %s2724_s15, 1024, %s259_s23, %s2613_s11, %s3518_s22, %s3518_s22, %s3517_s1  }
  0x76   : > { %p3520_p8 = scmp.ne.s32.totalorder %s3515_s17, 0 }
  0x78   : > { %270 = sbr.rel (%p3520_p8) target bundleno = 757 (0x2f5), region = 40 }
  0x7d   : > { %s2765_s13 = sand.u32 1, %s2505_s19   ;;  %p3521_p11 = scmp.ne.s32.totalorder %s3511_s16, 0 }
  0x7e   : > { %s2768_s7 = sshll.u32 %s2765_s13, 6  ;;  %s273_s30 = scalar_lea.sflag [#allocation3], %s2765_s13 }
  0x7f   : > { %s2772_s29 = scalar_lea.vmem [#allocation2], %s2768_s7 }
  0x80   : > { %2484 = dma.done.wait (%p3521_p11), %s273_s30, 1024  }
  0x81   : > { %2486 = vsyncadd (%p3521_p11), %s273_s30, 4294966272  ;;  %s281_s11 = sand.u32 1, %s2646_s14   ;;  %s2780_s1 = scalar_lea.vmem [#allocation5], %s2768_s7 }
  0x82   : > { %s282_s17 = scalar_lea.sflag [#allocation6], %s281_s11 }
  0x83   : > { %2488 = dma.done.wait (%p3521_p11), %s282_s17, 2048  }
  0x84   : > { %2490 = vsyncadd (%p3521_p11), %s282_s17, 4294965248  ;;  %s2787_s22 = scalar_lea.vmem [#allocation7], %s2768_s7  ;;  %p3522_p6 = scmp.eq.s32.totalorder %s2646_s14, 0 }
  0x86   : > { %2492 = dma.done.wait (%p3522_p6), [#allocation9], 3072   ;;  %p3523_p12 = pmov %p3522_p6 }
  0x87   : > { %v2794_v0 = vld [vmem:[%s2772_s29] sm:$0xff]   ;;  %v2808_v6 = vld [vmem:[%s2772_s29 + $0x8] sm:$0xff]   ;;  %v2820_v10 = vld [vmem:[%s2772_s29 + $0x10] sm:$0xff]   ;;  %s3379_s23 = scalar_lea.vmem [#allocation10], %s2768_s7  ;;  %s1815_s12 = sshll.u32 %s2646_s14, 10 }
  0x88   : > { %2494 = vsyncadd (%p3523_p12), [#allocation9], 4294964224  ;;  %v2797_v1 = vld [vmem:[%s2780_s1] sm:$0xff]   ;;  %v1818_v2 = vunpack.c.l.bf16 %v2794_v0  ;;  %v1819_v4 = vunpack.c.h.bf16 %v2794_v0  ;;  %v1822_v7 = vunpack.c.l.bf16 %v2808_v6  ;;  %v1823_v8 = vunpack.c.h.bf16 %v2808_v6  ;;  %v2817_v9 = vld [vmem:[%s2780_s1 + $0x8] sm:$0xff]   ;;  %s1605_s6 = sshll.u32 %s3379_s23, 4  ;;  %s3413_s26 = scalar_lea.hbm %s3465_s5, %s1815_s12  ;;  %s3415_s6 = int_to_ptr.vmem [resolvable:$true] %s1605_s6 }
  0x89   : > { %v1850_v3 = vunpack.c.l.bf16 %v2797_v1  ;;  %v1851_v5 = vunpack.c.h.bf16 %v2797_v1  ;;  %v1854_v11 = vunpack.c.l.bf16 %v2817_v9  ;;  %v1855_v12 = vunpack.c.h.bf16 %v2817_v9  ;;  %v2829_v13 = vld [vmem:[%s2780_s1 + $0x10] sm:$0xff]   ;;  %v2838_v16 = vld [vmem:[%s2772_s29 + $0x18] sm:$0xff]   ;;  %v2862_v24 = vld [vmem:[%s2772_s29 + $0x20] sm:$0xff]   ;;  %s1592_s14 = scalar_lea.sflag [#allocation4], %s2765_s13  ;;  %s2441_s27 = scalar_lea.vmem %s3415_s6, 1024 }
  0x8a   : > { %372 = vadd.xlane.f32.xlu0 %v1818_v2  ;;  %v1826_v14 = vunpack.c.l.bf16 %v2820_v10  ;;  %v1827_v15 = vunpack.c.h.bf16 %v2820_v10  ;;  %v1858_v17 = vunpack.c.l.bf16 %v2829_v13  ;;  %v1859_v18 = vunpack.c.h.bf16 %v2829_v13  ;;  %v2853_v21 = vld [vmem:[%s2780_s1 + $0x18] sm:$0xff]   ;;  %v2871_v27 = vld [vmem:[%s2780_s1 + $0x20] sm:$0xff]   ;;  %v2880_v30 = vld [vmem:[%s2772_s29 + $0x28] sm:$0xff]   ;;  %p2442_p2 = scmp.ne.s32.totalorder %s3415_s6, %s2441_s27  ;;  %p3554_p3 = scmp.ne.s32.totalorder %s3513_s8, 0 }
  0x8b   : > { %605 = vadd.xlane.f32.xlu1 %v1850_v3  ;;  %v1830_v19 = vunpack.c.l.bf16 %v2838_v16  ;;  %v1831_v20 = vunpack.c.h.bf16 %v2838_v16  ;;  %v1862_v22 = vunpack.c.l.bf16 %v2853_v21  ;;  %v1863_v23 = vunpack.c.h.bf16 %v2853_v21  ;;  %v2889_v33 = vld [vmem:[%s2780_s1 + $0x28] sm:$0xff]   ;;  %v2898_v36 = vld [vmem:[%s2772_s29 + $0x30] sm:$0xff]   ;;  %v2916_v42 = vld [vmem:[%s2772_s29 + $0x38] sm:$0xff]   ;;  %s2521_s24 = smov [#allocation10]  }
  0x8c   : > { %v1834_v25 = vunpack.c.l.bf16 %v2862_v24  ;;  %v1835_v26 = vunpack.c.h.bf16 %v2862_v24  ;;  %v1866_v28 = vunpack.c.l.bf16 %v2871_v27  ;;  %v1867_v29 = vunpack.c.h.bf16 %v2871_v27  ;;  %v2907_v39 = vld [vmem:[%s2780_s1 + $0x30] sm:$0xff]   ;;  %v2925_v45 = vld [vmem:[%s2780_s1 + $0x38] sm:$0xff]   ;;  %v2934_v48 = vld [vmem:[%s2787_s22] sm:$0xff]   ;;  %p2443_p7 = pnand %p2442_p2, %p3554_p3  ;;  %s2445_s28 = sshll.u32 %s2521_s24, 4  ;;  %s2446_s28 = int_to_ptr.vmem [resolvable:$false] %s2445_s28 }
  0x8d   : > { %v1838_v31 = vunpack.c.l.bf16 %v2880_v30  ;;  %v1839_v32 = vunpack.c.h.bf16 %v2880_v30  ;;  %v1870_v34 = vunpack.c.l.bf16 %v2889_v33  ;;  %v1871_v35 = vunpack.c.h.bf16 %v2889_v33  ;;  %v2943_v51 = vld [vmem:[%s2787_s22 + $0x20] sm:$0xff]   ;;  %v2952_v54 = vld [vmem:[%s2787_s22 + $0x8] sm:$0xff]   ;;  %v2970_v60 = vld [vmem:[%s2787_s22 + $0x10] sm:$0xff]   ;;  %s2447_s9 = scalar_lea.vmem %s2446_s28, 2048  ;;  %p2448_p0 = scmp.lt.s32.totalorder %s3415_s6, %s2446_s28 }
  0x8e   : > { %374 = vadd.xlane.f32.xlu0 %v1819_v4  ;;  %v1842_v37 = vunpack.c.l.bf16 %v2898_v36  ;;  %v1843_v38 = vunpack.c.h.bf16 %v2898_v36  ;;  %v1874_v40 = vunpack.c.l.bf16 %v2907_v39  ;;  %v1875_v41 = vunpack.c.h.bf16 %v2907_v39  ;;  %v2961_v57 = vld [vmem:[%s2787_s22 + $0x28] sm:$0xff]   ;;  %v2979_v63 = vld [vmem:[%s2787_s22 + $0x30] sm:$0xff]   ;;  %p2444_p4 = pneg %p2443_p7  ;;  %p2449_p13 = scmp.lt.s32.totalorder %s2447_s9, %s2441_s27 }
  0x8f   : > { %607 = vadd.xlane.f32.xlu1 %v1851_v5  ;;  %v3497_v43 = vunpack.c.l.bf16 %v2916_v42  ;;  %v3495_v44 = vunpack.c.h.bf16 %v2916_v42  ;;  %v3494_v46 = vunpack.c.l.bf16 %v2925_v45  ;;  %v3493_v47 = vunpack.c.h.bf16 %v2925_v45 }
  0x90   : > { %v3490_v49 = vunpack.c.l.bf16 %v2934_v48  ;;  %v3489_v50 = vunpack.c.h.bf16 %v2934_v48  ;;  %v3486_v52 = vunpack.c.l.bf16 %v2943_v51  ;;  %v3483_v53 = vunpack.c.h.bf16 %v2943_v51  ;;  %p2450_p1 = por %p2449_p13, %p2448_p0 }
  0x91   : > { %v3480_v55 = vunpack.c.l.bf16 %v2952_v54  ;;  %v3479_v56 = vunpack.c.h.bf16 %v2952_v54  ;;  %v3481_v58 = vunpack.c.l.bf16 %v2961_v57  ;;  %v3482_v59 = vunpack.c.h.bf16 %v2961_v57 }
  0x92   : > { %376 = vadd.xlane.f32.xlu0 %v1822_v7  ;;  %v3484_v61 = vunpack.c.l.bf16 %v2970_v60  ;;  %v3485_v62 = vunpack.c.h.bf16 %v2970_v60  ;;  %v3525_v39 = vunpack.c.h.bf16 %v2916_v42  ;;  %p2451_p5 = pnand %p2450_p1, %p2444_p4 }
  0x93   : > { %378 = vadd.xlane.f32.xlu1 %v1823_v8 }
  0x96   : > { %609 = vadd.xlane.f32.xlu0 %v1854_v11 }
  0x97   : > { %611 = vadd.xlane.f32.xlu1 %v1855_v12 }
  0x9a   : > { %380 = vadd.xlane.f32.xlu0 %v1826_v14 }
  0x9b   : > { %382 = vadd.xlane.f32.xlu1 %v1827_v15 }
  0x9e   : > { %613 = vadd.xlane.f32.xlu0 %v1858_v17 }
  0x9f   : > { %615 = vadd.xlane.f32.xlu1 %v1859_v18 }
  0xa2   : > { %384 = vadd.xlane.f32.xlu0 %v1830_v19 }
  0xa3   : > { %386 = vadd.xlane.f32.xlu1 %v1831_v20 }
  0xa6   : > { %617 = vadd.xlane.f32.xlu0 %v1862_v22 }
  0xa7   : > { %619 = vadd.xlane.f32.xlu1 %v1863_v23 }
  0xaa   : > { %388 = vadd.xlane.f32.xlu0 %v1834_v25 }
  0xab   : > { %390 = vadd.xlane.f32.xlu1 %v1835_v26 }
  0xae   : > { %621 = vadd.xlane.f32.xlu0 %v1866_v28 }
  0xaf   : > { %623 = vadd.xlane.f32.xlu1 %v1867_v29 }
  0xb2   : > { %392 = vadd.xlane.f32.xlu0 %v1838_v31 }
  0xb3   : > { %394 = vadd.xlane.f32.xlu1 %v1839_v32 }
  0xb6   : > { %625 = vadd.xlane.f32.xlu0 %v1870_v34 }
  0xb7   : > { %627 = vadd.xlane.f32.xlu1 %v1871_v35 }
  0xba   : > { %396 = vadd.xlane.f32.xlu0 %v1842_v37 }
  0xbb   : > { %398 = vadd.xlane.f32.xlu1 %v1843_v38 }
  0xbe   : > { %629 = vadd.xlane.f32.xlu0 %v1874_v40 }
  0xbf   : > { %631 = vadd.xlane.f32.xlu1 %v1875_v41 }
  0xc2   : > { %400 = vadd.xlane.f32.xlu0 %v3497_v43 }
  0xc3   : > { %402 = vadd.xlane.f32.xlu1 %v3495_v44 }
  0xc6   : > { %633 = vadd.xlane.f32.xlu0 %v3494_v46 }
  0xc7   : > { %635 = vadd.xlane.f32.xlu1 %v3493_v47 }
  0xca   : > { %1127 = vadd.xlane.f32.xlu0 %v3490_v49 }
  0xcb   : > { %1129 = vadd.xlane.f32.xlu1 %v3489_v50 }
  0xce   : > { %1143 = vadd.xlane.f32.xlu0 %v3486_v52 }
  0xcf   : > { %1145 = vadd.xlane.f32.xlu1 %v3483_v53 }
  0xd2   : > { %1131 = vadd.xlane.f32.xlu0 %v3480_v55  ;;  %v3487_v55 = vunpack.c.h.bf16 %v2979_v63 }
  0xd3   : > { %1133 = vadd.xlane.f32.xlu1 %v3479_v56  ;;  %v3488_v56 = vunpack.c.l.bf16 %v2979_v63 }
  0xd6   : > { %1147 = vadd.xlane.f32.xlu0 %v3481_v58  ;;  %v2988_v58 = vld [vmem:[%s2787_s22 + $0x18] sm:$0xff]  }
  0xd7   : > { %1149 = vadd.xlane.f32.xlu1 %v3482_v59  ;;  %v3491_v59 = vunpack.c.l.bf16 %v2988_v58  ;;  %v3492_v53 = vunpack.c.h.bf16 %v2988_v58 }
  0xda   : > { %1135 = vadd.xlane.f32.xlu0 %v3484_v61  ;;  %v2997_v61 = vld [vmem:[%s2787_s22 + $0x38] sm:$0xff]  }
  0xdb   : > { %1137 = vadd.xlane.f32.xlu1 %v3485_v62  ;;  %v3496_v62 = vunpack.c.l.bf16 %v2997_v61  ;;  %v3498_v52 = vunpack.c.h.bf16 %v2997_v61 }
  0xde   : > { %1151 = vadd.xlane.f32.xlu0 %v3488_v56 }
  0xdf   : > { %1153 = vadd.xlane.f32.xlu1 %v3487_v55 }
  0xe2   : > { %1139 = vadd.xlane.f32.xlu0 %v3491_v59 }
  0xe3   : > { %1141 = vadd.xlane.f32.xlu1 %v3492_v53 }
  0xe6   : > { %1155 = vadd.xlane.f32.xlu0 %v3496_v62 }
  0xe7   : > { %1157 = vadd.xlane.f32.xlu1 %v3498_v52 }
 0x113   : > { %v373_v55 = vpop.xlane.xlu0 %372 }
 0x114   : > { %v606_v56 = vpop.xlane.xlu1 %605  ;;  %v405_v50 = vmul.f32 0.0078125, %v373_v55 }
 0x115   : > { %v637_v49 = vmul.f32 0.0078125, %v606_v56 }
 0x116   : > { %v3011_v59 = vsub.f32 %v1818_v2, %v405_v50 }
 0x117   : > { %v3015_v53 = vsub.f32 %v1850_v3, %v637_v49  ;;  %v375_v47 = vpop.xlane.xlu0 %374 }
 0x118   : > { %v608_v46 = vpop.xlane.xlu1 %607  ;;  %v406_v44 = vmul.f32 0.0078125, %v375_v47  ;;  %v437_v62 = vmul.f32 %v3011_v59, %v3011_v59 }
 0x119   : > { %v638_v43 = vmul.f32 0.0078125, %v608_v46  ;;  %v669_v3 = vmul.f32 %v3015_v53, %v3015_v53 }
 0x11a   : > { %v3021_v52 = vsub.f32 %v1819_v4, %v406_v44  ;;  %453 = vadd.xlane.f32.xlu0 %v437_v62 }
 0x11b   : > { %v3025_v2 = vsub.f32 %v1851_v5, %v638_v43  ;;  %v377_v49 = vpop.xlane.xlu0 %376 }
 0x11c   : > { %v379_v50 = vpop.xlane.xlu1 %378  ;;  %v407_v55 = vmul.f32 0.0078125, %v377_v49  ;;  %v438_v47 = vmul.f32 %v3021_v52, %v3021_v52 }
 0x11d   : > { %v408_v56 = vmul.f32 0.0078125, %v379_v50  ;;  %v670_v4 = vmul.f32 %v3025_v2, %v3025_v2 }
 0x11e   : > { %v3033_v0 = vsub.f32 %v1822_v7, %v407_v55  ;;  %685 = vadd.xlane.f32.xlu0 %v669_v3  ;;  %455 = vadd.xlane.f32.xlu1 %v438_v47 }
 0x11f   : > { %v3037_v1 = vsub.f32 %v1823_v8, %v408_v56  ;;  %v610_v5 = vpop.xlane.xlu0 %609  ;;  %v2211_v56 = vld [vmem:[#allocation8 + $0x38] sm:$0xff]  }
 0x120   : > { %v612_v43 = vpop.xlane.xlu1 %611  ;;  %v639_v44 = vmul.f32 0.0078125, %v610_v5  ;;  %v439_v46 = vmul.f32 %v3033_v0, %v3033_v0  ;;  %2060 = vmatprep.subr.bf16.mxu1 %v2211_v56 }
 0x121   : > { %v640_v62 = vmul.f32 0.0078125, %v612_v43  ;;  %v440_v8 = vmul.f32 %v3037_v1, %v3037_v1  ;;  %2061 = vmatpush3.bf16.msra.mxu1 %v2211_v56  ;;  %v2215_v56 = vld [vmem:[#allocation8 + $0x28] sm:$0xff]  }
 0x122   : > { %v3045_v7 = vsub.f32 %v1854_v11, %v639_v44  ;;  %687 = vadd.xlane.f32.xlu1 %v670_v4  ;;  %457 = vadd.xlane.f32.xlu0 %v439_v46 }
 0x123   : > { %v3049_v6 = vsub.f32 %v1855_v12, %v640_v62  ;;  %v381_v3 = vpop.xlane.xlu0 %380  ;;  %v2213_v62 = vld [vmem:[#allocation8 + $0x30] sm:$0xff]  }
 0x124   : > { %v383_v49 = vpop.xlane.xlu1 %382  ;;  %v409_v50 = vmul.f32 0.0078125, %v381_v3  ;;  %v671_v55 = vmul.f32 %v3045_v7, %v3045_v7  ;;  %2062 = vmatprep.subr.bf16.mxu1 %v2213_v62 }
 0x125   : > { %v410_v47 = vmul.f32 0.0078125, %v383_v49  ;;  %v672_v12 = vmul.f32 %v3049_v6, %v3049_v6  ;;  %2063 = vmatpush3.bf16.msra.mxu1 %v2213_v62 }
 0x126   : > { %v3057_v11 = vsub.f32 %v1826_v14, %v409_v50  ;;  %459 = vadd.xlane.f32.xlu1 %v440_v8  ;;  %689 = vadd.xlane.f32.xlu0 %v671_v55  ;;  %v2212_v14 = vld [vmem:[#allocation8 + $0x78] sm:$0xff]  }
 0x127   : > { %v3061_v9 = vsub.f32 %v1827_v15, %v410_v47  ;;  %v614_v4 = vpop.xlane.xlu0 %613  ;;  %2028 = vmatprep.subr.bf16.mxu0 %v2212_v14  ;;  %2064 = vmatprep.subr.bf16.mxu1 %v2215_v56 }
 0x128   : > { %v616_v5 = vpop.xlane.xlu1 %615  ;;  %v641_v43 = vmul.f32 0.0078125, %v614_v4  ;;  %v441_v44 = vmul.f32 %v3057_v11, %v3057_v11  ;;  %2029 = vmatpush3.bf16.msra.mxu0 %v2212_v14  ;;  %v2217_v14 = vld [vmem:[#allocation8 + $0x20] sm:$0xff]  }
 0x129   : > { %v642_v46 = vmul.f32 0.0078125, %v616_v5  ;;  %v442_v15 = vmul.f32 %v3061_v9, %v3061_v9  ;;  %2065 = vmatpush3.bf16.msra.mxu1 %v2215_v56 }
 0x12a   : > { %v3069_v8 = vsub.f32 %v1858_v17, %v641_v43  ;;  %691 = vadd.xlane.f32.xlu1 %v672_v12  ;;  %461 = vadd.xlane.f32.xlu0 %v441_v44  ;;  %v2214_v17 = vld [vmem:[#allocation8 + $0x70] sm:$0xff]  }
 0x12b   : > { %v3073_v10 = vsub.f32 %v1859_v18, %v642_v46  ;;  %v385_v3 = vpop.xlane.xlu0 %384  ;;  %2030 = vmatprep.subr.bf16.mxu0 %v2214_v17  ;;  %2066 = vmatprep.subr.bf16.mxu1 %v2217_v14 }
 0x12c   : > { %v387_v49 = vpop.xlane.xlu1 %386  ;;  %v411_v50 = vmul.f32 0.0078125, %v385_v3  ;;  %v673_v55 = vmul.f32 %v3069_v8, %v3069_v8  ;;  %2031 = vmatpush3.bf16.msra.mxu0 %v2214_v17 }
 0x12d   : > { %v412_v47 = vmul.f32 0.0078125, %v387_v49  ;;  %v674_v12 = vmul.f32 %v3073_v10, %v3073_v10  ;;  %2067 = vmatpush3.bf16.msra.mxu1 %v2217_v14 }
 0x12e   : > { %v3081_v13 = vsub.f32 %v1830_v19, %v411_v50  ;;  %463 = vadd.xlane.f32.xlu1 %v442_v15  ;;  %693 = vadd.xlane.f32.xlu0 %v673_v55  ;;  %v2216_v19 = vld [vmem:[#allocation8 + $0x68] sm:$0xff]  }
 0x12f   : > { %v3085_v18 = vsub.f32 %v1831_v20, %v412_v47  ;;  %v618_v4 = vpop.xlane.xlu0 %617  ;;  %2032 = vmatprep.subr.bf16.mxu0 %v2216_v19  ;;  %v2219_v47 = vld [vmem:[#allocation8 + $0x18] sm:$0xff]  }
 0x130   : > { %v620_v5 = vpop.xlane.xlu1 %619  ;;  %v643_v43 = vmul.f32 0.0078125, %v618_v4  ;;  %v443_v44 = vmul.f32 %v3081_v13, %v3081_v13  ;;  %2033 = vmatpush3.bf16.msra.mxu0 %v2216_v19  ;;  %2068 = vmatprep.subr.bf16.mxu1 %v2219_v47 }
 0x131   : > { %v644_v46 = vmul.f32 0.0078125, %v620_v5  ;;  %v444_v62 = vmul.f32 %v3085_v18, %v3085_v18  ;;  %2069 = vmatpush3.bf16.msra.mxu1 %v2219_v47 }
 0x132   : > { %v3093_v16 = vsub.f32 %v1862_v22, %v643_v43  ;;  %695 = vadd.xlane.f32.xlu1 %v674_v12  ;;  %465 = vadd.xlane.f32.xlu0 %v443_v44  ;;  %v2218_v22 = vld [vmem:[#allocation8 + $0x60] sm:$0xff]   ;;  %v2221_v44 = vld [vmem:[#allocation8 + $0x10] sm:$0xff]  }
 0x133   : > { %v3097_v20 = vsub.f32 %v1863_v23, %v644_v46  ;;  %v389_v15 = vpop.xlane.xlu0 %388  ;;  %2034 = vmatprep.subr.bf16.mxu0 %v2218_v22  ;;  %2070 = vmatprep.subr.bf16.mxu1 %v2221_v44 }
 0x134   : > { %v391_v3 = vpop.xlane.xlu1 %390  ;;  %v413_v49 = vmul.f32 0.0078125, %v389_v15  ;;  %v675_v50 = vmul.f32 %v3093_v16, %v3093_v16  ;;  %2035 = vmatpush3.bf16.msra.mxu0 %v2218_v22 }
 0x135   : > { %v414_v55 = vmul.f32 0.0078125, %v391_v3  ;;  %v676_v17 = vmul.f32 %v3097_v20, %v3097_v20  ;;  %2071 = vmatpush3.bf16.msra.mxu1 %v2221_v44 }
 0x136   : > { %v3105_v21 = vsub.f32 %v1834_v25, %v413_v49  ;;  %467 = vadd.xlane.f32.xlu1 %v444_v62  ;;  %697 = vadd.xlane.f32.xlu0 %v675_v50  ;;  %v2220_v25 = vld [vmem:[#allocation8 + $0x58] sm:$0xff]   ;;  %v2223_v49 = vld [vmem:[#allocation8 + $0x8] sm:$0xff]  }
 0x137   : > { %v3109_v23 = vsub.f32 %v1835_v26, %v414_v55  ;;  %v622_v56 = vpop.xlane.xlu0 %621  ;;  %2036 = vmatprep.subr.bf16.mxu0 %v2220_v25  ;;  %2072 = vmatprep.subr.bf16.mxu1 %v2223_v49 }
 0x138   : > { %v624_v12 = vpop.xlane.xlu1 %623  ;;  %v645_v4 = vmul.f32 0.0078125, %v622_v56  ;;  %v445_v5 = vmul.f32 %v3105_v21, %v3105_v21  ;;  %2037 = vmatpush3.bf16.msra.mxu0 %v2220_v25 }
 0x139   : > { %v646_v43 = vmul.f32 0.0078125, %v624_v12  ;;  %v446_v46 = vmul.f32 %v3109_v23, %v3109_v23  ;;  %2073 = vmatpush3.bf16.msra.mxu1 %v2223_v49  ;;  %v2225_v12 = vld [vmem:[#allocation8] sm:$0xff]  }
 0x13a   : > { %v3117_v24 = vsub.f32 %v1866_v28, %v645_v4  ;;  %699 = vadd.xlane.f32.xlu1 %v676_v17  ;;  %469 = vadd.xlane.f32.xlu0 %v445_v5  ;;  %v2222_v28 = vld [vmem:[#allocation8 + $0x50] sm:$0xff]  }
 0x13b   : > { %v3121_v26 = vsub.f32 %v1867_v29, %v646_v43  ;;  %v393_v19 = vpop.xlane.xlu0 %392  ;;  %2038 = vmatprep.subr.bf16.mxu0 %v2222_v28  ;;  %2074 = vmatprep.subr.bf16.mxu1 %v2225_v12 }
 0x13c   : > { %v395_v14 = vpop.xlane.xlu1 %394  ;;  %v415_v62 = vmul.f32 0.0078125, %v393_v19  ;;  %v677_v15 = vmul.f32 %v3117_v24, %v3117_v24  ;;  %2039 = vmatpush3.bf16.msra.mxu0 %v2222_v28 }
 0x13d   : > { %v416_v3 = vmul.f32 0.0078125, %v395_v14  ;;  %v678_v50 = vmul.f32 %v3121_v26, %v3121_v26  ;;  %2075 = vmatpush3.bf16.msra.mxu1 %v2225_v12 }
 0x13e   : > { %v3129_v27 = vsub.f32 %v1838_v31, %v415_v62  ;;  %471 = vadd.xlane.f32.xlu1 %v446_v46  ;;  %701 = vadd.xlane.f32.xlu0 %v677_v15  ;;  %v2224_v31 = vld [vmem:[#allocation8 + $0x48] sm:$0xff]  }
 0x13f   : > { %v3133_v29 = vsub.f32 %v1839_v32, %v416_v3  ;;  %v626_v55 = vpop.xlane.xlu0 %625  ;;  %2040 = vmatprep.subr.bf16.mxu0 %v2224_v31 }
 0x140   : > { %v628_v22 = vpop.xlane.xlu1 %627  ;;  %v647_v47 = vmul.f32 0.0078125, %v626_v55  ;;  %v447_v17 = vmul.f32 %v3129_v27, %v3129_v27  ;;  %2041 = vmatpush3.bf16.msra.mxu0 %v2224_v31 }
 0x141   : > { %v648_v56 = vmul.f32 0.0078125, %v628_v22  ;;  %v448_v4 = vmul.f32 %v3133_v29, %v3133_v29 }
 0x142   : > { %v3141_v30 = vsub.f32 %v1870_v34, %v647_v47  ;;  %703 = vadd.xlane.f32.xlu1 %v678_v50  ;;  %473 = vadd.xlane.f32.xlu0 %v447_v17  ;;  %v2226_v34 = vld [vmem:[#allocation8 + $0x40] sm:$0xff]   ;;  %v3524_v17 = vunpack.c.l.bf16 %v2916_v42  ;;  %v3527_v42 = vunpack.c.h.bf16 %v2925_v45 }
 0x143   : > { %v3145_v32 = vsub.f32 %v1871_v35, %v648_v56  ;;  %v397_v5 = vpop.xlane.xlu0 %396  ;;  %2042 = vmatprep.subr.bf16.mxu0 %v2226_v34 }
 0x144   : > { %v399_v43 = vpop.xlane.xlu1 %398  ;;  %v417_v25 = vmul.f32 0.0078125, %v397_v5  ;;  %v679_v44 = vmul.f32 %v3141_v30, %v3141_v30  ;;  %2043 = vmatpush3.bf16.msra.mxu0 %v2226_v34 }
 0x145   : > { %v418_v46 = vmul.f32 0.0078125, %v399_v43  ;;  %v680_v19 = vmul.f32 %v3145_v32, %v3145_v32 }
 0x146   : > { %v3153_v33 = vsub.f32 %v1842_v37, %v417_v25  ;;  %475 = vadd.xlane.f32.xlu1 %v448_v4  ;;  %705 = vadd.xlane.f32.xlu0 %v679_v44  ;;  %v3526_v25 = vunpack.c.l.bf16 %v2925_v45  ;;  %v3529_v45 = vunpack.c.h.bf16 %v2934_v48 }
 0x147   : > { %v3157_v35 = vsub.f32 %v1843_v38, %v418_v46  ;;  %v630_v14 = vpop.xlane.xlu0 %629 }
 0x148   : > { %v632_v62 = vpop.xlane.xlu1 %631  ;;  %v649_v15 = vmul.f32 0.0078125, %v630_v14  ;;  %v449_v3 = vmul.f32 %v3153_v33, %v3153_v33 }
 0x149   : > { %v650_v28 = vmul.f32 0.0078125, %v632_v62  ;;  %v450_v38 = vmul.f32 %v3157_v35, %v3157_v35 }
 0x14a   : > { %v3165_v37 = vsub.f32 %v1874_v40, %v649_v15  ;;  %707 = vadd.xlane.f32.xlu1 %v680_v19  ;;  %477 = vadd.xlane.f32.xlu0 %v449_v3 }
 0x14b   : > { %v3169_v36 = vsub.f32 %v1875_v41, %v650_v28  ;;  %v401_v49 = vpop.xlane.xlu0 %400  ;;  %v3528_v28 = vunpack.c.l.bf16 %v2934_v48  ;;  %v3531_v48 = vunpack.c.h.bf16 %v2943_v51 }
 0x14c   : > { %v403_v50 = vpop.xlane.xlu1 %402  ;;  %v419_v55 = vmul.f32 0.0078125, %v401_v49  ;;  %v681_v22 = vmul.f32 %v3165_v37, %v3165_v37 }
 0x14d   : > { %v420_v47 = vmul.f32 0.0078125, %v403_v50  ;;  %v682_v56 = vmul.f32 %v3169_v36, %v3169_v36 }
 0x14e   : > { %v3177_v40 = vsub.f32 %v3524_v17, %v419_v55  ;;  %479 = vadd.xlane.f32.xlu1 %v450_v38  ;;  %709 = vadd.xlane.f32.xlu0 %v681_v22 }
 0x14f   : > { %v3181_v41 = vsub.f32 %v3525_v39, %v420_v47  ;;  %v634_v31 = vpop.xlane.xlu0 %633 }
 0x150   : > { %v636_v12 = vpop.xlane.xlu1 %635  ;;  %v651_v4 = vmul.f32 0.0078125, %v634_v31  ;;  %v451_v5 = vmul.f32 %v3177_v40, %v3177_v40 }
 0x151   : > { %v652_v43 = vmul.f32 0.0078125, %v636_v12  ;;  %v452_v34 = vmul.f32 %v3181_v41, %v3181_v41 }
 0x152   : > { %v3189_v44 = vsub.f32 %v3526_v25, %v651_v4  ;;  %711 = vadd.xlane.f32.xlu1 %v682_v56  ;;  %481 = vadd.xlane.f32.xlu0 %v451_v5  ;;  %v3530_v56 = vunpack.c.l.bf16 %v2943_v51  ;;  %v3533_v51 = vunpack.c.h.bf16 %v2952_v54 }
 0x153   : > { %v3193_v46 = vsub.f32 %v3527_v42, %v652_v43  ;;  %v1128_v19 = vpop.xlane.xlu0 %1127 }
 0x154   : > { %v1130_v14 = vpop.xlane.xlu1 %1129  ;;  %v1159_v62 = vmul.f32 0.0078125, %v1128_v19  ;;  %v683_v15 = vmul.f32 %v3189_v44, %v3189_v44  ;;  %v3532_v19 = vunpack.c.l.bf16 %v2952_v54  ;;  %v3535_v54 = vunpack.c.h.bf16 %v2961_v57 }
 0x155   : > { %v1160_v3 = vmul.f32 0.0078125, %v1130_v14  ;;  %v684_v50 = vmul.f32 %v3193_v46, %v3193_v46 }
 0x156   : > { %v3201_v38 = vsub.f32 %v3528_v28, %v1159_v62  ;;  %483 = vadd.xlane.f32.xlu1 %v452_v34  ;;  %713 = vadd.xlane.f32.xlu0 %v683_v15 }
 0x157   : > { %v3205_v49 = vsub.f32 %v3529_v45, %v1160_v3  ;;  %v1144_v55 = vpop.xlane.xlu0 %1143 }
 0x158   : > { %v1146_v22 = vpop.xlane.xlu1 %1145  ;;  %v1167_v47 = vmul.f32 0.0078125, %v1144_v55  ;;  %v1191_v17 = vmul.f32 %v3201_v38, %v3201_v38 }
 0x159   : > { %v1168_v39 = vmul.f32 0.0078125, %v1146_v22  ;;  %v1192_v4 = vmul.f32 %v3205_v49, %v3205_v49  ;;  %v3534_v22 = vunpack.c.l.bf16 %v2961_v57  ;;  %v3537_v57 = vunpack.c.h.bf16 %v2970_v60 }
 0x15a   : > { %v3213_v31 = vsub.f32 %v3530_v56, %v1167_v47  ;;  %715 = vadd.xlane.f32.xlu1 %v684_v50  ;;  %1207 = vadd.xlane.f32.xlu0 %v1191_v17 }
 0x15b   : > { %v3217_v12 = vsub.f32 %v3531_v48, %v1168_v39  ;;  %v1132_v5 = vpop.xlane.xlu0 %1131 }
 0x15c   : > { %v1134_v43 = vpop.xlane.xlu1 %1133  ;;  %v1161_v25 = vmul.f32 0.0078125, %v1132_v5  ;;  %v1199_v42 = vmul.f32 %v3213_v31, %v3213_v31 }
 0x15d   : > { %v1162_v34 = vmul.f32 0.0078125, %v1134_v43  ;;  %v1200_v15 = vmul.f32 %v3217_v12, %v3217_v12 }
 0x15e   : > { %v3225_v14 = vsub.f32 %v3532_v19, %v1161_v25  ;;  %1209 = vadd.xlane.f32.xlu1 %v1192_v4  ;;  %1223 = vadd.xlane.f32.xlu0 %v1199_v42  ;;  %v3247_v25 = vld [vmem:[#allocation8 + $0xb8] sm:$0xff]   ;;  %v3536_v42 = vunpack.c.l.bf16 %v2970_v60  ;;  %v3539_v60 = vunpack.c.h.bf16 %v2979_v63 }
 0x15f   : > { %v3229_v62 = vsub.f32 %v3533_v51, %v1162_v34  ;;  %v1148_v3 = vpop.xlane.xlu0 %1147  ;;  %2092 = vmatprep.subr.bf16.mxu0 %v3247_v25  ;;  %2124 = vmatprep.subr.bf16.mxu1 %v3247_v25 }
 0x160   : > { %v1150_v28 = vpop.xlane.xlu1 %1149  ;;  %v1169_v45 = vmul.f32 0.0078125, %v1148_v3  ;;  %v1193_v50 = vmul.f32 %v3225_v14, %v3225_v14 }
 0x161   : > { %v1170_v55 = vmul.f32 0.0078125, %v1150_v28  ;;  %v1194_v39 = vmul.f32 %v3229_v62, %v3229_v62 }
 0x162   : > { %v3237_v47 = vsub.f32 %v3534_v22, %v1169_v45  ;;  %1225 = vadd.xlane.f32.xlu1 %v1200_v15  ;;  %1211 = vadd.xlane.f32.xlu0 %v1193_v50 }
 0x163   : > { %v3241_v17 = vsub.f32 %v3535_v54, %v1170_v55  ;;  %v1136_v56 = vpop.xlane.xlu0 %1135  ;;  %v3538_v55 = vunpack.c.l.bf16 %v2979_v63  ;;  %v3543_v63 = vunpack.c.h.bf16 %v2988_v58 }
 0x164   : > { %v1138_v48 = vpop.xlane.xlu1 %1137  ;;  %v1163_v4 = vmul.f32 0.0078125, %v1136_v56  ;;  %v1201_v5 = vmul.f32 %v3237_v47, %v3237_v47 }
 0x165   : > { %v1164_v43 = vmul.f32 0.0078125, %v1138_v48  ;;  %v1202_v51 = vmul.f32 %v3241_v17, %v3241_v17 }
 0x166   : > { %v3251_v34 = vsub.f32 %v3536_v42, %v1163_v4  ;;  %1213 = vadd.xlane.f32.xlu1 %v1194_v39  ;;  %1227 = vadd.xlane.f32.xlu0 %v1201_v5  ;;  %v3541_v42 = vunpack.c.l.bf16 %v2988_v58  ;;  %v3547_v58 = vunpack.c.h.bf16 %v2997_v61 }
 0x167   : > { %v3255_v19 = vsub.f32 %v3537_v57, %v1164_v43  ;;  %v1152_v15 = vpop.xlane.xlu0 %1151 }
 0x168   : > { %v1154_v3 = vpop.xlane.xlu1 %1153  ;;  %v1171_v28 = vmul.f32 0.0078125, %v1152_v15  ;;  %v1195_v45 = vmul.f32 %v3251_v34, %v3251_v34 }
 0x169   : > { %v1172_v50 = vmul.f32 0.0078125, %v1154_v3  ;;  %v1196_v39 = vmul.f32 %v3255_v19, %v3255_v19 }
 0x16a   : > { %v3265_v22 = vsub.f32 %v3538_v55, %v1171_v28  ;;  %1229 = vadd.xlane.f32.xlu1 %v1202_v51  ;;  %1215 = vadd.xlane.f32.xlu0 %v1195_v45 }
 0x16b   : > { %v3269_v54 = vsub.f32 %v3539_v60, %v1172_v50  ;;  %v1140_v56 = vpop.xlane.xlu0 %1139  ;;  %v3545_v60 = vunpack.c.l.bf16 %v2997_v61 }
 0x16c   : > { %v1142_v48 = vpop.xlane.xlu1 %1141  ;;  %v1165_v4 = vmul.f32 0.0078125, %v1140_v56  ;;  %v1203_v5 = vmul.f32 %v3265_v22, %v3265_v22 }
 0x16d   : > { %3540 = vst [vmem:[#allocation18_spill] sm:$0xff] %v3269_v54  ;;  %v1166_v43 = vmul.f32 0.0078125, %v1142_v48  ;;  %v1204_v15 = vmul.f32 %v3269_v54, %v3269_v54 }
 0x16e   : > { %v3277_v57 = vsub.f32 %v3541_v42, %v1165_v4  ;;  %1217 = vadd.xlane.f32.xlu1 %v1196_v39  ;;  %1231 = vadd.xlane.f32.xlu0 %v1203_v5 }
 0x16f   : > { %v3281_v51 = vsub.f32 %v3543_v63, %v1166_v43  ;;  %v1156_v3 = vpop.xlane.xlu0 %1155 }
 0x170   : > { %3542 = vst [vmem:[#allocation19_spill] sm:$0xff] %v3277_v57  ;;  %v1158_v28 = vpop.xlane.xlu1 %1157  ;;  %v1173_v45 = vmul.f32 0.0078125, %v1156_v3  ;;  %v1197_v50 = vmul.f32 %v3277_v57, %v3277_v57 }
 0x171   : > { %3544 = vst [vmem:[#allocation20_spill] sm:$0xff] %v3281_v51  ;;  %v1174_v55 = vmul.f32 0.0078125, %v1158_v28  ;;  %v1198_v48 = vmul.f32 %v3281_v51, %v3281_v51 }
 0x172   : > { %v3289_v56 = vsub.f32 %v3545_v60, %v1173_v45  ;;  %1233 = vadd.xlane.f32.xlu1 %v1204_v15  ;;  %1219 = vadd.xlane.f32.xlu0 %v1197_v50 }
 0x173   : > { %v3293_v39 = vsub.f32 %v3547_v58, %v1174_v55 }
 0x174   : > { %3546 = vst [vmem:[#allocation21_spill] sm:$0xff] %v3289_v56  ;;  %v1205_v4 = vmul.f32 %v3289_v56, %v3289_v56 }
 0x175   : > { %3548 = vst [vmem:[#allocation22_spill] sm:$0xff] %v3293_v39  ;;  %v1206_v5 = vmul.f32 %v3293_v39, %v3293_v39 }
 0x176   : > { %1221 = vadd.xlane.f32.xlu1 %v1198_v48  ;;  %1235 = vadd.xlane.f32.xlu0 %v1205_v4 }
 0x17a   : > { %1237 = vadd.xlane.f32.xlu1 %v1206_v5 }
 0x1a3   : > { %v454_v43 = vpop.xlane.xlu0 %453 }
 0x1a4   : > { %v485_v42 = vmul.f32 0.0078125, %v454_v43 }
 0x1a6   : > { %v501_v63 = vadd.f32 1e-12, %v485_v42 }
 0x1a7   : > { %v456_v15 = vpop.xlane.xlu1 %455  ;;  %v686_v3 = vpop.xlane.xlu0 %685 }
 0x1a8   : > { %v486_v61 = vmul.f32 0.0078125, %v456_v15  ;;  %v717_v28 = vmul.f32 0.0078125, %v686_v3  ;;  %2235 = vrsqrt.f32 %v501_v63 }
 0x1aa   : > { %v502_v45 = vadd.f32 1e-12, %v486_v61  ;;  %v733_v50 = vadd.f32 1e-12, %v717_v28 }
 0x1ab   : > { %v688_v55 = vpop.xlane.xlu1 %687  ;;  %v458_v60 = vpop.xlane.xlu0 %457 }
 0x1ac   : > { %2237 = vrsqrt.f32 %v502_v45  ;;  %v718_v58 = vmul.f32 0.0078125, %v688_v55  ;;  %v487_v48 = vmul.f32 0.0078125, %v458_v60 }
 0x1ad   : > { %2239 = vrsqrt.f32 %v733_v50 }
 0x1ae   : > { %v734_v4 = vadd.f32 1e-12, %v718_v58  ;;  %v503_v56 = vadd.f32 1e-12, %v487_v48 }
 0x1af   : > { %v460_v39 = vpop.xlane.xlu1 %459  ;;  %v690_v5 = vpop.xlane.xlu0 %689 }
 0x1b0   : > { %2241 = vrsqrt.f32 %v734_v4  ;;  %v488_v43 = vmul.f32 0.0078125, %v460_v39  ;;  %v719_v42 = vmul.f32 0.0078125, %v690_v5 }
 0x1b1   : > { %2243 = vrsqrt.f32 %v503_v56 }
 0x1b2   : > { %v504_v51 = vadd.f32 1e-12, %v488_v43  ;;  %v735_v15 = vadd.f32 1e-12, %v719_v42 }
 0x1b3   : > { %v692_v3 = vpop.xlane.xlu1 %691  ;;  %v462_v63 = vpop.xlane.xlu0 %461 }
 0x1b4   : > { %2245 = vrsqrt.f32 %v504_v51  ;;  %v720_v61 = vmul.f32 0.0078125, %v692_v3  ;;  %v489_v28 = vmul.f32 0.0078125, %v462_v63 }
 0x1b5   : > { %v2236_v57 = vpop.eup %2235  ;;  %2247 = vrsqrt.f32 %v735_v15 }
 0x1b6   : > { %v736_v45 = vadd.f32 1e-12, %v720_v61  ;;  %v505_v55 = vadd.f32 1e-12, %v489_v28  ;;  %v533_v39 = vmul.f32 %v2236_v57, %v3011_v59 }
 0x1b7   : > { %v464_v50 = vpop.xlane.xlu1 %463  ;;  %v694_v60 = vpop.xlane.xlu0 %693 }
 0x1b8   : > { %2249 = vrsqrt.f32 %v736_v45  ;;  %v490_v58 = vmul.f32 0.0078125, %v464_v50  ;;  %v721_v48 = vmul.f32 0.0078125, %v694_v60 }
 0x1b9   : > { %v2238_v4 = vpop.eup %2237  ;;  %2251 = vrsqrt.f32 %v505_v55 }
 0x1ba   : > { %v2240_v56 = vpop.eup %2239  ;;  %v506_v5 = vadd.f32 1e-12, %v490_v58  ;;  %v737_v43 = vadd.f32 1e-12, %v721_v48  ;;  %v534_v51 = vmul.f32 %v2238_v4, %v3021_v52 }
 0x1bb   : > { %v696_v42 = vpop.xlane.xlu1 %695  ;;  %v466_v3 = vpop.xlane.xlu0 %465  ;;  %v765_v45 = vmul.f32 %v2240_v56, %v3015_v53 }
 0x1bc   : > { %2253 = vrsqrt.f32 %v506_v5  ;;  %v722_v15 = vmul.f32 0.0078125, %v696_v42  ;;  %v491_v63 = vmul.f32 0.0078125, %v466_v3  ;;  %v549_v61 = vpack.c.bf16 %v534_v51, %v533_v39 }
 0x1bd   : > { %v2242_v28 = vpop.eup %2241  ;;  %2255 = vrsqrt.f32 %v737_v43 }
 0x1be   : > { %v2244_v50 = vpop.eup %2243  ;;  %v738_v60 = vadd.f32 1e-12, %v722_v15  ;;  %v507_v54 = vadd.f32 1e-12, %v491_v63  ;;  %2076 = vmatprep.mubr.bf16.mxu1 %v549_v61  ;;  %v766_v59 = vmul.f32 %v2242_v28, %v3025_v2 }
 0x1bf   : > { %v468_v57 = vpop.xlane.xlu1 %467  ;;  %v698_v55 = vpop.xlane.xlu0 %697  ;;  %v535_v5 = vmul.f32 %v2244_v50, %v3033_v0 }
 0x1c0   : > { %2257 = vrsqrt.f32 %v738_v60  ;;  %v492_v52 = vmul.f32 0.0078125, %v468_v57  ;;  %v723_v58 = vmul.f32 0.0078125, %v698_v55  ;;  %v781_v48 = vpack.c.bf16 %v766_v59, %v765_v45  ;;  %v2228_v45 = vld [vmem:[#allocation8 + $0xb0] sm:$0xff]  }
 0x1c1   : > { %v2246_v4 = vpop.eup %2245  ;;  %2259 = vrsqrt.f32 %v507_v54 }
 0x1c2   : > { %v508_v39 = vadd.f32 1e-12, %v492_v52  ;;  %v739_v51 = vadd.f32 1e-12, %v723_v58  ;;  %2044 = vmatprep.mubr.bf16.mxu0 %v781_v48  ;;  %v536_v53 = vmul.f32 %v2246_v4, %v3037_v1  ;;  %v2248_v56 = vpop.eup %2247  ;;  %v2229_v4 = vld [vmem:[#allocation8 + $0xa8] sm:$0xff]  }
 0x1c3   : > { %v700_v43 = vpop.xlane.xlu1 %699  ;;  %v470_v42 = vpop.xlane.xlu0 %469  ;;  %v767_v0 = vmul.f32 %v2248_v56, %v3045_v7 }
 0x1c4   : > { %2261 = vrsqrt.f32 %v508_v39  ;;  %v724_v2 = vmul.f32 0.0078125, %v700_v43  ;;  %v493_v3 = vmul.f32 0.0078125, %v470_v42  ;;  %v550_v15 = vpack.c.bf16 %v536_v53, %v535_v5 }
 0x1c5   : > { %v2250_v63 = vpop.eup %2249  ;;  %2263 = vrsqrt.f32 %v739_v51 }
 0x1c6   : > { %v740_v61 = vadd.f32 1e-12, %v724_v2  ;;  %v509_v28 = vadd.f32 1e-12, %v493_v3  ;;  %2077 = vmatmul.mubr.bf16.vlgmr.msra.gmra.mxu1 %v550_v15  ;;  %v768_v54 = vmul.f32 %v2250_v63, %v3049_v6  ;;  %v2252_v50 = vpop.eup %2251  ;;  %v2230_v15 = vld [vmem:[#allocation8 + $0xa0] sm:$0xff]  }
 0x1c7   : > { %v472_v60 = vpop.xlane.xlu1 %471  ;;  %v702_v1 = vpop.xlane.xlu0 %701  ;;  %2132 = vmatpush3.bf16.msra.mxu1 %v3247_v25  ;;  %v537_v7 = vmul.f32 %v2252_v50, %v3057_v11 }
 0x1c8   : > { %2265 = vrsqrt.f32 %v740_v61  ;;  %v494_v59 = vmul.f32 0.0078125, %v472_v60  ;;  %v725_v57 = vmul.f32 0.0078125, %v702_v1  ;;  %v782_v55 = vpack.c.bf16 %v768_v54, %v767_v0  ;;  %2125 = vmatprep.subr.bf16.mxu1 %v2228_v45 }
 0x1c9   : > { %v2254_v52 = vpop.eup %2253  ;;  %2267 = vrsqrt.f32 %v509_v28 }
 0x1ca   : > { %v510_v58 = vadd.f32 1e-12, %v494_v59  ;;  %v741_v48 = vadd.f32 1e-12, %v725_v57  ;;  %2045 = vmatmul.mubr.bf16.vlgmr.msra.gmra.mxu0 %v782_v55  ;;  %v538_v6 = vmul.f32 %v2254_v52, %v3061_v9  ;;  %v2256_v5 = vpop.eup %2255  ;;  %v2231_v57 = vld [vmem:[#allocation8 + $0x98] sm:$0xff]  }
 0x1cb   : > { %v704_v39 = vpop.xlane.xlu1 %703  ;;  %v474_v51 = vpop.xlane.xlu0 %473  ;;  %2093 = vmatpush3.bf16.msra.mxu0 %v3247_v25  ;;  %2133 = vmatpush3.bf16.msra.mxu1 %v2228_v45  ;;  %v769_v11 = vmul.f32 %v2256_v5, %v3069_v8 }
 0x1cc   : > { %2269 = vrsqrt.f32 %v510_v58  ;;  %v726_v53 = vmul.f32 0.0078125, %v704_v39  ;;  %v495_v56 = vmul.f32 0.0078125, %v474_v51  ;;  %v551_v43 = vpack.c.bf16 %v538_v6, %v537_v7  ;;  %2094 = vmatprep.subr.bf16.mxu0 %v2228_v45  ;;  %2126 = vmatprep.subr.bf16.mxu1 %v2229_v4  ;;  %v2232_v51 = vld [vmem:[#allocation8 + $0x90] sm:$0xff]  }
 0x1cd   : > { %v2258_v42 = vpop.eup %2257  ;;  %2271 = vrsqrt.f32 %v741_v48 }
 0x1ce   : > { %v742_v2 = vadd.f32 1e-12, %v726_v53  ;;  %v511_v3 = vadd.f32 1e-12, %v495_v56  ;;  %2080 = vmatprep.mubr.bf16.mxu1 %v551_v43  ;;  %v770_v9 = vmul.f32 %v2258_v42, %v3073_v10  ;;  %v2260_v63 = vpop.eup %2259 }
 0x1cf   : > { %v476_v61 = vpop.xlane.xlu1 %475  ;;  %v706_v25 = vpop.xlane.xlu0 %705  ;;  %2095 = vmatpush3.bf16.msra.mxu0 %v2228_v45  ;;  %2134 = vmatpush3.bf16.msra.mxu1 %v2229_v4  ;;  %v539_v8 = vmul.f32 %v2260_v63, %v3081_v13  ;;  %v2233_v63 = vld [vmem:[#allocation8 + $0x88] sm:$0xff]  }
 0x1d0   : > { %2273 = vrsqrt.f32 %v742_v2  ;;  %v496_v28 = vmul.f32 0.0078125, %v476_v61  ;;  %v727_v0 = vmul.f32 0.0078125, %v706_v25  ;;  %v783_v54 = vpack.c.bf16 %v770_v9, %v769_v11  ;;  %2096 = vmatprep.subr.bf16.mxu0 %v2229_v4  ;;  %2127 = vmatprep.subr.bf16.mxu1 %v2230_v15 }
 0x1d1   : > { %v2262_v50 = vpop.eup %2261  ;;  %2275 = vrsqrt.f32 %v511_v3 }
 0x1d2   : > { %v2264_v60 = vpop.eup %2263  ;;  %v512_v1 = vadd.f32 1e-12, %v496_v28  ;;  %v743_v59 = vadd.f32 1e-12, %v727_v0  ;;  %2048 = vmatprep.mubr.bf16.mxu0 %v783_v54  ;;  %v540_v10 = vmul.f32 %v2262_v50, %v3085_v18 }
 0x1d3   : > { %v708_v55 = vpop.xlane.xlu1 %707  ;;  %v478_v45 = vpop.xlane.xlu0 %477  ;;  %2097 = vmatpush3.bf16.msra.mxu0 %v2229_v4  ;;  %2135 = vmatpush3.bf16.msra.mxu1 %v2230_v15  ;;  %v771_v6 = vmul.f32 %v2264_v60, %v3093_v16 }
 0x1d4   : > { %2277 = vrsqrt.f32 %v512_v1  ;;  %v728_v52 = vmul.f32 0.0078125, %v708_v55  ;;  %v497_v58 = vmul.f32 0.0078125, %v478_v45  ;;  %v552_v48 = vpack.c.bf16 %v540_v10, %v539_v8  ;;  %2098 = vmatprep.subr.bf16.mxu0 %v2230_v15  ;;  %2128 = vmatprep.subr.bf16.mxu1 %v2231_v57 }
 0x1d5   : > { %v2266_v7 = vpop.eup %2265  ;;  %2279 = vrsqrt.f32 %v743_v59  ;;  %v2234_v59 = vld [vmem:[#allocation8 + $0x80] sm:$0xff]  }
 0x1d6   : > { %v2268_v5 = vpop.eup %2267  ;;  %v744_v39 = vadd.f32 1e-12, %v728_v52  ;;  %v513_v13 = vadd.f32 1e-12, %v497_v58  ;;  %2081 = vmatmul.mubr.bf16.gmra.mxu1 %v552_v48  ;;  %v772_v18 = vmul.f32 %v2266_v7, %v3097_v20 }
 0x1d7   : > { %v480_v53 = vpop.xlane.xlu1 %479  ;;  %v710_v4 = vpop.xlane.xlu0 %709  ;;  %2099 = vmatpush3.bf16.msra.mxu0 %v2230_v15  ;;  %2136 = vmatpush3.bf16.msra.mxu1 %v2231_v57  ;;  %v541_v16 = vmul.f32 %v2268_v5, %v3105_v21 }
 0x1d8   : > { %2281 = vrsqrt.f32 %v744_v39  ;;  %v498_v56 = vmul.f32 0.0078125, %v480_v53  ;;  %v729_v43 = vmul.f32 0.0078125, %v710_v4  ;;  %v784_v42 = vpack.c.bf16 %v772_v18, %v771_v6  ;;  %2100 = vmatprep.subr.bf16.mxu0 %v2231_v57  ;;  %2129 = vmatprep.subr.bf16.mxu1 %v2232_v51 }
 0x1d9   : > { %v2270_v2 = vpop.eup %2269  ;;  %2283 = vrsqrt.f32 %v513_v13 }
 0x1da   : > { %v2272_v3 = vpop.eup %2271  ;;  %v514_v11 = vadd.f32 1e-12, %v498_v56  ;;  %v745_v9 = vadd.f32 1e-12, %v729_v43  ;;  %2049 = vmatmul.mubr.bf16.gmra.mxu0 %v784_v42  ;;  %v542_v20 = vmul.f32 %v2270_v2, %v3109_v23 }
 0x1db   : > { %v712_v61 = vpop.xlane.xlu1 %711  ;;  %v482_v15 = vpop.xlane.xlu0 %481  ;;  %2101 = vmatpush3.bf16.msra.mxu0 %v2231_v57  ;;  %2137 = vmatpush3.bf16.msra.mxu1 %v2232_v51  ;;  %v773_v21 = vmul.f32 %v2272_v3, %v3117_v24 }
 0x1dc   : > { %2285 = vrsqrt.f32 %v514_v11  ;;  %v730_v25 = vmul.f32 0.0078125, %v712_v61  ;;  %v499_v28 = vmul.f32 0.0078125, %v482_v15  ;;  %v553_v0 = vpack.c.bf16 %v542_v20, %v541_v16  ;;  %2102 = vmatprep.subr.bf16.mxu0 %v2232_v51  ;;  %2130 = vmatprep.subr.bf16.mxu1 %v2233_v63 }
 0x1dd   : > { %v2274_v54 = vpop.eup %2273  ;;  %2287 = vrsqrt.f32 %v745_v9 }
 0x1de   : > { %v2276_v50 = vpop.eup %2275  ;;  %v746_v60 = vadd.f32 1e-12, %v730_v25  ;;  %v515_v1 = vadd.f32 1e-12, %v499_v28  ;;  %2084 = vmatprep.mubr.bf16.mxu1 %v553_v0  ;;  %v774_v23 = vmul.f32 %v2274_v54, %v3121_v26 }
 0x1df   : > { %v484_v8 = vpop.xlane.xlu1 %483  ;;  %v714_v10 = vpop.xlane.xlu0 %713  ;;  %2103 = vmatpush3.bf16.msra.mxu0 %v2232_v51  ;;  %2138 = vmatpush3.bf16.msra.mxu1 %v2233_v63  ;;  %v543_v24 = vmul.f32 %v2276_v50, %v3129_v27 }
 0x1e0   : > { %2289 = vrsqrt.f32 %v746_v60  ;;  %v500_v57 = vmul.f32 0.0078125, %v484_v8  ;;  %v731_v55 = vmul.f32 0.0078125, %v714_v10  ;;  %v785_v45 = vpack.c.bf16 %v774_v23, %v773_v21  ;;  %2104 = vmatprep.subr.bf16.mxu0 %v2233_v63  ;;  %2131 = vmatprep.subr.bf16.mxu1 %v2234_v59 }
 0x1e1   : > { %v2278_v52 = vpop.eup %2277  ;;  %2291 = vrsqrt.f32 %v515_v1 }
 0x1e2   : > { %v516_v58 = vadd.f32 1e-12, %v500_v57  ;;  %v747_v48 = vadd.f32 1e-12, %v731_v55  ;;  %2052 = vmatprep.mubr.bf16.mxu0 %v785_v45  ;;  %v544_v26 = vmul.f32 %v2278_v52, %v3133_v29  ;;  %v2280_v7 = vpop.eup %2279 }
 0x1e3   : > { %v716_v6 = vpop.xlane.xlu1 %715  ;;  %v1208_v5 = vpop.xlane.xlu0 %1207  ;;  %2105 = vmatpush3.bf16.msra.mxu0 %v2233_v63  ;;  %2139 = vmatpush3.bf16.msra.mxu1 %v2234_v59  ;;  %v775_v4 = vmul.f32 %v2280_v7, %v3141_v30 }
 0x1e4   : > { %2293 = vrsqrt.f32 %v516_v58  ;;  %v732_v39 = vmul.f32 0.0078125, %v716_v6  ;;  %v1239_v13 = vmul.f32 0.0078125, %v1208_v5  ;;  %v554_v18 = vpack.c.bf16 %v544_v26, %v543_v24  ;;  %2106 = vmatprep.subr.bf16.mxu0 %v2234_v59 }
 0x1e5   : > { %v2282_v51 = vpop.eup %2281  ;;  %2295 = vrsqrt.f32 %v747_v48 }
 0x1e6   : > { %v748_v53 = vadd.f32 1e-12, %v732_v39  ;;  %v1255_v27 = vadd.f32 1e-12, %v1239_v13  ;;  %2085 = vmatmul.mubr.bf16.gmra.mxu1 %v554_v18  ;;  %v776_v56 = vmul.f32 %v2282_v51, %v3145_v32  ;;  %v2284_v29 = vpop.eup %2283 }
 0x1e7   : > { %v1210_v43 = vpop.xlane.xlu1 %1209  ;;  %v1224_v42 = vpop.xlane.xlu0 %1223  ;;  %2107 = vmatpush3.bf16.msra.mxu0 %v2234_v59  ;;  %v545_v63 = vmul.f32 %v2284_v29, %v3153_v33 }
 0x1e8   : > { %2297 = vrsqrt.f32 %v748_v53  ;;  %v1240_v2 = vmul.f32 0.0078125, %v1210_v43  ;;  %v1247_v16 = vmul.f32 0.0078125, %v1224_v42  ;;  %v786_v3 = vpack.c.bf16 %v776_v56, %v775_v4 }
 0x1e9   : > { %v2286_v11 = vpop.eup %2285  ;;  %2299 = vrsqrt.f32 %v1255_v27 }
 0x1ea   : > { %v1256_v9 = vadd.f32 1e-12, %v1240_v2  ;;  %v1263_v20 = vadd.f32 1e-12, %v1247_v16  ;;  %2053 = vmatmul.mubr.bf16.gmra.mxu0 %v786_v3  ;;  %v546_v61 = vmul.f32 %v2286_v11, %v3157_v35  ;;  %v2288_v30 = vpop.eup %2287 }
 0x1eb   : > { %v1226_v15 = vpop.xlane.xlu1 %1225  ;;  %v1212_v32 = vpop.xlane.xlu0 %1211  ;;  %v777_v60 = vmul.f32 %v2288_v30, %v3165_v37 }
 0x1ec   : > { %2301 = vrsqrt.f32 %v1256_v9  ;;  %v1248_v25 = vmul.f32 0.0078125, %v1226_v15  ;;  %v1241_v28 = vmul.f32 0.0078125, %v1212_v32  ;;  %v555_v0 = vpack.c.bf16 %v546_v61, %v545_v63 }
 0x1ed   : > { %v2290_v54 = vpop.eup %2289  ;;  %2303 = vrsqrt.f32 %v1263_v20 }
 0x1ee   : > { %v1264_v21 = vadd.f32 1e-12, %v1248_v25  ;;  %v1257_v50 = vadd.f32 1e-12, %v1241_v28  ;;  %2088 = vmatprep.mubr.bf16.mxu1 %v555_v0  ;;  %v778_v1 = vmul.f32 %v2290_v54, %v3169_v36  ;;  %v2292_v23 = vpop.eup %2291 }
 0x1ef   : > { %v1214_v33 = vpop.xlane.xlu1 %1213  ;;  %v1228_v59 = vpop.xlane.xlu0 %1227  ;;  %v547_v24 = vmul.f32 %v2292_v23, %v3177_v40 }
 0x1f0   : > { %2305 = vrsqrt.f32 %v1264_v21  ;;  %v1242_v35 = vmul.f32 0.0078125, %v1214_v33  ;;  %v1249_v8 = vmul.f32 0.0078125, %v1228_v59  ;;  %v787_v10 = vpack.c.bf16 %v778_v1, %v777_v60 }
 0x1f1   : > { %v2294_v57 = vpop.eup %2293  ;;  %2307 = vrsqrt.f32 %v1257_v50 }
 0x1f2   : > { %v2296_v55 = vpop.eup %2295  ;;  %v1258_v45 = vadd.f32 1e-12, %v1242_v35  ;;  %v1265_v52 = vadd.f32 1e-12, %v1249_v8  ;;  %2056 = vmatprep.mubr.bf16.mxu0 %v787_v10  ;;  %v548_v58 = vmul.f32 %v2294_v57, %v3181_v41 }
 0x1f3   : > { %v1230_v37 = vpop.xlane.xlu1 %1229  ;;  %v1216_v48 = vpop.xlane.xlu0 %1215  ;;  %v779_v5 = vmul.f32 %v2296_v55, %v3189_v44 }
 0x1f4   : > { %2309 = vrsqrt.f32 %v1258_v45  ;;  %v1250_v36 = vmul.f32 0.0078125, %v1230_v37  ;;  %v1243_v26 = vmul.f32 0.0078125, %v1216_v48  ;;  %v556_v7 = vpack.c.bf16 %v548_v58, %v547_v24  ;;  %v3549_v48 = vld [vmem:[#allocation18_spill] sm:$0xff] }
 0x1f5   : > { %v2298_v6 = vpop.eup %2297  ;;  %2311 = vrsqrt.f32 %v1265_v52 }
 0x1f6   : > { %v2300_v39 = vpop.eup %2299  ;;  %v1266_v13 = vadd.f32 1e-12, %v1250_v36  ;;  %v1259_v18 = vadd.f32 1e-12, %v1243_v26  ;;  %2089 = vmatmul.mubr.bf16.gmra.mxu1 %v556_v7  ;;  %v780_v51 = vmul.f32 %v2298_v6, %v3193_v46  ;;  %v3550_v7 = vld [vmem:[#allocation19_spill] sm:$0xff] }
 0x1f7   : > { %v1218_v53 = vpop.xlane.xlu1 %1217  ;;  %v1232_v40 = vpop.xlane.xlu0 %1231  ;;  %v1287_v29 = vmul.f32 %v2300_v39, %v3201_v38 }
 0x1f8   : > { %2313 = vrsqrt.f32 %v1266_v13  ;;  %v1244_v41 = vmul.f32 0.0078125, %v1218_v53  ;;  %v1251_v27 = vmul.f32 0.0078125, %v1232_v40  ;;  %v788_v4 = vpack.c.bf16 %v780_v51, %v779_v5  ;;  %v3551_v5 = vld [vmem:[#allocation20_spill] sm:$0xff]  ;;  %v3553_v53 = vld [vmem:[#allocation22_spill] sm:$0xff] }
 0x1f9   : > { %v2302_v56 = vpop.eup %2301  ;;  %2315 = vrsqrt.f32 %v1259_v18 }
 0x1fa   : > { %v2304_v43 = vpop.eup %2303  ;;  %v1260_v42 = vadd.f32 1e-12, %v1244_v41  ;;  %v1267_v44 = vadd.f32 1e-12, %v1251_v27  ;;  %2057 = vmatmul.mubr.bf16.gmra.mxu0 %v788_v4  ;;  %v1288_v2 = vmul.f32 %v2302_v56, %v3205_v49 }
 0x1fb   : > { %v1234_v16 = vpop.xlane.xlu1 %1233  ;;  %v1220_v3 = vpop.xlane.xlu0 %1219  ;;  %v1295_v63 = vmul.f32 %v2304_v43, %v3213_v31 }
 0x1fc   : > { %2317 = vrsqrt.f32 %v1260_v42  ;;  %v1252_v46 = vmul.f32 0.0078125, %v1234_v16  ;;  %v1245_v11 = vmul.f32 0.0078125, %v1220_v3  ;;  %v1303_v9 = vpack.c.bf16 %v1288_v2, %v1287_v29 }
 0x1fd   : > { %v2306_v20 = vpop.eup %2305  ;;  %2319 = vrsqrt.f32 %v1267_v44 }
 0x1fe   : > { %v2308_v61 = vpop.eup %2307  ;;  %v1268_v30 = vadd.f32 1e-12, %v1252_v46  ;;  %v1261_v38 = vadd.f32 1e-12, %v1245_v11  ;;  %2108 = vmatprep.mubr.bf16.mxu0 %v1303_v9  ;;  %v1296_v15 = vmul.f32 %v2306_v20, %v3217_v12 }
 0x1ff   : > { %v1222_v32 = vpop.xlane.xlu1 %1221  ;;  %v1236_v25 = vpop.xlane.xlu0 %1235  ;;  %v1289_v21 = vmul.f32 %v2308_v61, %v3225_v14 }
 0x200   : > { %2321 = vrsqrt.f32 %v1268_v30  ;;  %v1246_v49 = vmul.f32 0.0078125, %v1222_v32  ;;  %v1253_v28 = vmul.f32 0.0078125, %v1236_v25  ;;  %v1307_v0 = vpack.c.bf16 %v1296_v15, %v1295_v63 }
 0x201   : > { %v2310_v54 = vpop.eup %2309  ;;  %2323 = vrsqrt.f32 %v1261_v38 }
 0x202   : > { %v1262_v50 = vadd.f32 1e-12, %v1246_v49  ;;  %v1269_v60 = vadd.f32 1e-12, %v1253_v28  ;;  %2116 = vmatprep.mubr.bf16.mxu1 %v1307_v0  ;;  %v1290_v31 = vmul.f32 %v2310_v54, %v3229_v62  ;;  %v2312_v1 = vpop.eup %2311 }
 0x203   : > { %v1238_v23 = vpop.xlane.xlu1 %1237  ;;  %v1297_v8 = vmul.f32 %v2312_v1, %v3237_v47 }
 0x204   : > { %2325 = vrsqrt.f32 %v1262_v50  ;;  %v1254_v33 = vmul.f32 0.0078125, %v1238_v23  ;;  %v1304_v12 = vpack.c.bf16 %v1290_v31, %v1289_v21 }
 0x205   : > { %v2314_v59 = vpop.eup %2313  ;;  %2327 = vrsqrt.f32 %v1269_v60 }
 0x206   : > { %v1270_v35 = vadd.f32 1e-12, %v1254_v33  ;;  %2109 = vmatmul.mubr.bf16.vlgmr.msra.gmra.mxu0 %v1304_v12  ;;  %v1298_v10 = vmul.f32 %v2314_v59, %v3241_v17  ;;  %v2316_v14 = vpop.eup %2315 }
 0x207   : > { %v1291_v62 = vmul.f32 %v2316_v14, %v3251_v34  ;;  %v3372_v14 = vld [vmem:[%s3464_s4] ss:$0 sm:$0xff] }
 0x208   : > { %2329 = vrsqrt.f32 %v1270_v35  ;;  %v1308_v57 = vpack.c.bf16 %v1298_v10, %v1297_v8 }
 0x209   : > { %v2318_v55 = vpop.eup %2317 }
 0x20a   : > { %2117 = vmatmul.mubr.bf16.vlgmr.msra.gmra.mxu1 %v1308_v57  ;;  %v1292_v45 = vmul.f32 %v2318_v55, %v3255_v19  ;;  %v2320_v52 = vpop.eup %2319  ;;  %v3552_v19 = vld [vmem:[#allocation21_spill] sm:$0xff] }
 0x20b   : > { %v1299_v37 = vmul.f32 %v2320_v52, %v3265_v22 }
 0x20c   : > { %v1305_v24 = vpack.c.bf16 %v1292_v45, %v1291_v62 }
 0x20d   : > { %v2322_v58 = vpop.eup %2321 }
 0x20e   : > { %2112 = vmatprep.mubr.bf16.mxu0 %v1305_v24  ;;  %v1300_v36 = vmul.f32 %v2322_v58, %v3549_v48  ;;  %v2324_v47 = vpop.eup %2323 }
 0x20f   : > { %v1293_v6 = vmul.f32 %v2324_v47, %v3550_v7 }
 0x210   : > { %v1309_v26 = vpack.c.bf16 %v1300_v36, %v1299_v37 }
 0x211   : > { %v2326_v17 = vpop.eup %2325 }
 0x212   : > { %2120 = vmatprep.mubr.bf16.mxu1 %v1309_v26  ;;  %v1294_v39 = vmul.f32 %v2326_v17, %v3551_v5  ;;  %v2328_v13 = vpop.eup %2327 }
 0x213   : > { %v1301_v51 = vmul.f32 %v2328_v13, %v3552_v19 }
 0x214   : > { %v1306_v34 = vpack.c.bf16 %v1294_v39, %v1293_v6 }
 0x215   : > { %v2330_v18 = vpop.eup %2329 }
 0x216   : > { %2113 = vmatmul.mubr.bf16.gmra.mxu0 %v1306_v34  ;;  %v1302_v40 = vmul.f32 %v2330_v18, %v3553_v53 }
 0x218   : > { %v1310_v41 = vpack.c.bf16 %v1302_v40, %v1301_v51 }
 0x21a   : > { %2121 = vmatmul.mubr.bf16.gmra.mxu1 %v1310_v41 }
 0x286   : > { %v2078_v27 = vpop.f32.mrf.mxu1 }
 0x288   : > { %v1032_v56 = vpop.f32.mrf.mxu1 }
 0x28a   : > { %v2046_v22 = vpop.f32.mrf.mxu0  ;;  %v2079_v43 = vpop.f32.mrf.mxu1 }
 0x28b   : > { %v1041_v33 = vadd.f32 %v2078_v27, %v2046_v22 }
 0x28c   : > { %v887_v4 = vpop.f32.mrf.mxu0  ;;  %v1035_v44 = vpop.f32.mrf.mxu1 }
 0x28d   : > { %v1033_v12 = vadd.f32 %v1032_v56, %v887_v4 }
 0x28e   : > { %v2047_v29 = vpop.f32.mrf.mxu0 }
 0x28f   : > { %v1044_v8 = vadd.f32 %v2079_v43, %v2047_v29 }
 0x290   : > { %v890_v42 = vpop.f32.mrf.mxu0 }
 0x291   : > { %v1036_v45 = vadd.f32 %v1035_v44, %v890_v42 }
 0x296   : > { %v3353_v16 = vpop.f32.mrf.mxu1 }
 0x298   : > { %v3357_v46 = vpop.f32.mrf.mxu1 }
 0x29a   : > { %v3351_v2 = vpop.f32.mrf.mxu0  ;;  %v3361_v9 = vpop.f32.mrf.mxu1 }
 0x29b   : > { %v1057_v42 = vadd.f32 %v3353_v16, %v3351_v2 }
 0x29c   : > { %v3355_v3 = vpop.f32.mrf.mxu0  ;;  %v3365_v63 = vpop.f32.mrf.mxu1 }
 0x29d   : > { %v1049_v44 = vadd.f32 %v3357_v46, %v3355_v3 }
 0x29e   : > { %v3359_v11 = vpop.f32.mrf.mxu0 }
 0x2a0   : > { %v3363_v20 = vpop.f32.mrf.mxu0 }
 0x2a6   : > { %v2086_v30 = vpop.f32.mrf.mxu1 }
 0x2a8   : > { %v1064_v15 = vpop.f32.mrf.mxu1 }
 0x2aa   : > { %v2054_v61 = vpop.f32.mrf.mxu0  ;;  %v2087_v25 = vpop.f32.mrf.mxu1 }
 0x2ab   : > { %v1073_v52 = vadd.f32 %v2086_v30, %v2054_v61  ;;  %v1060_v30 = vadd.f32 %v3361_v9, %v3359_v11 }
 0x2ac   : > { %v919_v38 = vpop.f32.mrf.mxu0  ;;  %v1067_v28 = vpop.f32.mrf.mxu1 }
 0x2ad   : > { %v1065_v58 = vadd.f32 %v1064_v15, %v919_v38 }
 0x2ae   : > { %v2055_v32 = vpop.f32.mrf.mxu0 }
 0x2af   : > { %v1076_v37 = vadd.f32 %v2087_v25, %v2055_v32 }
 0x2b0   : > { %v922_v49 = vpop.f32.mrf.mxu0 }
 0x2b1   : > { %v1068_v6 = vadd.f32 %v1067_v28, %v922_v49  ;;  %v1052_v49 = vadd.f32 %v3365_v63, %v3363_v20 }
 0x2b6   : > { %v2090_v54 = vpop.f32.mrf.mxu1 }
 0x2b8   : > { %v1080_v50 = vpop.f32.mrf.mxu1 }
 0x2ba   : > { %v2058_v0 = vpop.f32.mrf.mxu0  ;;  %v2091_v31 = vpop.f32.mrf.mxu1 }
 0x2bb   : > { %v1089_v28 = vadd.f32 %v2090_v54, %v2058_v0 }
 0x2bc   : > { %v935_v21 = vpop.f32.mrf.mxu0  ;;  %v1083_v59 = vpop.f32.mrf.mxu1 }
 0x2be   : > { %v2059_v60 = vpop.f32.mrf.mxu0 }
 0x2bf   : > { %v1092_v2 = vadd.f32 %v2091_v31, %v2059_v60 }
 0x2c0   : > { %v3367_v1 = vpop.f32.mrf.mxu0 }
 0x2c6   : > { %v2110_v23 = vpop.f32.mrf.mxu0 }
 0x2c7   : > { %v1474_v10 = vadd.f32 %v2110_v23, %v1041_v33  ;;  %v1081_v33 = vadd.f32 %v1080_v50, %v935_v21 }
 0x2c8   : > { %v1409_v35 = vpop.f32.mrf.mxu0 }
 0x2c9   : > { %v1472_v57 = vadd.f32 %v1409_v35, %v1033_v12  ;;  %v1497_v47 = vadd.f32 %v3372_v14, %v1474_v10  ;;  %v1084_v35 = vadd.f32 %v1083_v59, %v3367_v1 }
 0x2ca   : > { %v2111_v55 = vpop.f32.mrf.mxu0  ;;  %v2118_v62 = vpop.f32.mrf.mxu1 }
 0x2cb   : > { %v1475_v24 = vadd.f32 %v2111_v55, %v1044_v8  ;;  %v1482_v17 = vadd.f32 %v2118_v62, %v1073_v52  ;;  %v1495_v5 = vadd.f32 %v3372_v14, %v1472_v57 }
 0x2cc   : > { %v1412_v48 = vpop.f32.mrf.mxu0  ;;  %v1441_v36 = vpop.f32.mrf.mxu1 }
 0x2cd   : > { %v1498_v26 = vadd.f32 %v3372_v14, %v1475_v24  ;;  %v1473_v7 = vadd.f32 %v1412_v48, %v1036_v45  ;;  %v1480_v18 = vadd.f32 %v1441_v36, %v1065_v58  ;;  %v1505_v53 = vadd.f32 %v3372_v14, %v1482_v17 }
 0x2ce   : > { %v2119_v39 = vpop.f32.mrf.mxu1 }
 0x2cf   : > { %v1920_v13 = vpack.c.bf16 %v1498_v26, %v1497_v47  ;;  %v1496_v34 = vadd.f32 %v3372_v14, %v1473_v7  ;;  %v1483_v19 = vadd.f32 %v2119_v39, %v1076_v37  ;;  %v1503_v27 = vadd.f32 %v3372_v14, %v1480_v18 }
 0x2d0   : > { %v1444_v51 = vpop.f32.mrf.mxu1 }
 0x2d1   : > { %1973 = vst [vmem:[%s3379_s23 + $0x8] sm:$0xff] %v1920_v13   ;;  %v1915_v40 = vpack.c.bf16 %v1496_v34, %v1495_v5  ;;  %v1506_v41 = vadd.f32 %v3372_v14, %v1483_v19  ;;  %v1481_v22 = vadd.f32 %v1444_v51, %v1068_v6 }
 0x2d3   : > { %1916 = vst [vmem:[%s3379_s23] sm:$0xff] %v1915_v40   ;;  %v1940_v4 = vpack.c.bf16 %v1506_v41, %v1505_v53  ;;  %v1504_v56 = vadd.f32 %v3372_v14, %v1481_v22 }
 0x2d5   : > { %1977 = vst [vmem:[%s3379_s23 + $0x28] sm:$0xff] %v1940_v4   ;;  %v1935_v29 = vpack.c.bf16 %v1504_v56, %v1503_v27 }
 0x2d6   : > { %v2114_v43 = vpop.f32.mrf.mxu0 }
 0x2d7   : > { %1976 = vst [vmem:[%s3379_s23 + $0x20] sm:$0xff] %v1935_v29   ;;  %v1478_v38 = vadd.f32 %v2114_v43, %v1057_v42 }
 0x2d8   : > { %v1425_v61 = vpop.f32.mrf.mxu0 }
 0x2d9   : > { %v1476_v15 = vadd.f32 %v1425_v61, %v1049_v44  ;;  %v1501_v3 = vadd.f32 %v3372_v14, %v1478_v38 }
 0x2da   : > { %v2115_v32 = vpop.f32.mrf.mxu0  ;;  %v2122_v25 = vpop.f32.mrf.mxu1 }
 0x2db   : > { %v1479_v23 = vadd.f32 %v2115_v32, %v1060_v30  ;;  %v1486_v11 = vadd.f32 %v2122_v25, %v1089_v28  ;;  %v1499_v20 = vadd.f32 %v3372_v14, %v1476_v15 }
 0x2dc   : > { %v1428_v16 = vpop.f32.mrf.mxu0  ;;  %v1457_v12 = vpop.f32.mrf.mxu1 }
 0x2dd   : > { %v1502_v46 = vadd.f32 %v3372_v14, %v1479_v23  ;;  %v1477_v9 = vadd.f32 %v1428_v16, %v1052_v49  ;;  %v1484_v21 = vadd.f32 %v1457_v12, %v1081_v33  ;;  %v1509_v31 = vadd.f32 %v3372_v14, %v1486_v11 }
 0x2de   : > { %v2123_v63 = vpop.f32.mrf.mxu1 }
 0x2df   : > { %v1930_v0 = vpack.c.bf16 %v1502_v46, %v1501_v3  ;;  %v1500_v54 = vadd.f32 %v3372_v14, %v1477_v9  ;;  %v1487_v50 = vadd.f32 %v2123_v63, %v1092_v2  ;;  %v1507_v59 = vadd.f32 %v3372_v14, %v1484_v21 }
 0x2e0   : > { %v1460_v60 = vpop.f32.mrf.mxu1 }
 0x2e1   : > { %1975 = vst [vmem:[%s3379_s23 + $0x18] sm:$0xff] %v1930_v0   ;;  %v1925_v8 = vpack.c.bf16 %v1500_v54, %v1499_v20  ;;  %v1510_v10 = vadd.f32 %v3372_v14, %v1487_v50  ;;  %v1485_v1 = vadd.f32 %v1460_v60, %v1084_v35 }
 0x2e3   : > { %1974 = vst [vmem:[%s3379_s23 + $0x10] sm:$0xff] %v1925_v8   ;;  %v1950_v57 = vpack.c.bf16 %v1510_v10, %v1509_v31  ;;  %v1508_v55 = vadd.f32 %v3372_v14, %v1485_v1 }
 0x2e5   : > { %1979 = vst [vmem:[%s3379_s23 + $0x38] sm:$0xff] %v1950_v57   ;;  %v1945_v62 = vpack.c.bf16 %v1508_v55, %v1507_v59 }
 0x2e7   : > { %1978 = vst [vmem:[%s3379_s23 + $0x30] sm:$0xff] %v1945_v62  }
 0x2e8   : > { %2454 = shalt.err (!%p2451_p5)
}
 0x2e9   : > { %s2455_s7 = scalar_lea.hbm %s3413_s26, 1024  ;;  %s2459_s11 = scalar_lea.hbm %s3465_s5, 2048 }
 0x2ea   : > { %p2456_p9 = scmp.ne.s32.totalorder %s3413_s26, %s2455_s7  ;;  %p2460_p11 = scmp.lt.s32.totalorder %s3413_s26, %s3465_s5 }
 0x2eb   : > { %p2461_p6 = scmp.lt.s32.totalorder %s2459_s11, %s2455_s7 }
 0x2ec   : > { %p2457_p10 = pnand %p2456_p9, %p3554_p3 }
 0x2ed   : > { %p2462_p12 = por %p2461_p6, %p2460_p11 }
 0x2ee   : > { %p2458_p8 = pneg %p2457_p10 }
 0x2f0   : > { %p2463_p2 = pnand %p2462_p12, %p2458_p8 }
 0x2f2   : > { %2466 = shalt.err (!%p2463_p2)
}
 0x2f3   : > { %s2522_s22 = smov 64   ;;  %s2523_s16 = smov 4  }
 0x2f4   : > { %2150 = dma.vmem_to_hbm [thread:$0]  (%p3554_p3), %s3415_s6, 1024, %s3413_s26, %s1592_s14, %s2522_s22, %s2522_s22, %s2523_s16  }
 0x2f5 PF: > { %s1620_s15 = sand.u32 1, %s2501_s18   ;;  %p3555_p7 = scmp.ne.s32.totalorder %s3514_s10, 0 }
 0x2f6   : > { %p3556_p4 = scmp.ge.s32.totalorder %s2513_s21, 2  ;;  %s1621_s23 = scalar_lea.sflag [#allocation4], %s1620_s15 }
 0x2f8   : > { %p2167_p0 = pnand %p3556_p4, %p3555_p7 }
 0x2fa   : > { %p2168_p13 = pneg %p2167_p0 }
 0x2fc   : > { %2496 = dma.done.wait (%p2168_p13), %s1621_s23, 1024  }
 0x2fd   : > { %2498 = vsyncadd (%p2168_p13), %s1621_s23, 4294966272  ;;  %s3557_s21 = sld [smem:[#allocation16_spill]]  ;;  %s3560_s18 = smov %s2505_s19 }
 0x2fe   : > { %s3558_s12 = sld [smem:[#allocation15_spill]] }
 0x2ff   : > { %s3559_s20 = sld [smem:[#allocation17_spill]] }
 0x303   : > { %p22_p1 = scmp.ge.s32.totalorder %s3557_s21, 4  }
 0x304   : > { %s3561_s19 = smov %s3558_s12 }
 0x305   :  { %24 = sbr.rel (!%p22_p1) target bundleno = 10 (0xa), region = 113 }
 0x30a   :  { %1626 = vsyncpa [#allocation3], 1 }
 0x30b   :  { %1628 = vsyncpa [#allocation3 + $0x1], 1 }
 0x30c   :  { %1629 = vsyncpa [#allocation6], 1 }
 0x30d   :  { %1631 = vsyncpa [#allocation6 + $0x1], 1 }
 0x30e   :  { %1632 = vsyncpa [#allocation9], 1 }
 0x30f   :  { %1633 = vsyncpa [#allocation4], 1 }
 0x310   :  { %1635 = vsyncpa [#allocation4 + $0x1], 1 }

</bundles_post_ra>
